<compile_context>
chip_gen: v7x
topology: tpu7x:2x2x1
jax: 0.10.0
libtpu: 0.0.40
codegen_flags: <defaults>
</compile_context>

<pallas_src>
import functools
import operator

import jax
import jax.numpy as jnp
from jax.experimental import pallas as pl
from jax.experimental.pallas import tpu as pltpu

INPUT_DIM = 2048       # vocab size V
EMBEDDING_DIM = 128    # E
HIDDEN_DIM = 64        # H


def _cost_pred_kernel(idx_ref, w1e_ref, b1_ref, w2_ref, b2_ref, out_ref):
    """One batch tile.

    idx_ref : (Bt, S) int32 token ids                      (VMEM)
    w1e_ref : (V, H)  fused emb @ fc1.weight^T             (VMEM, bf16 or f32)
    b1_ref  : (1, H)  fc1 bias                             (VMEM, f32)
    w2_ref  : (1, H)  fc2 weight row                       (VMEM, f32)
    b2_ref  : (1, 1)  fc2 bias scalar                      (SMEM, f32)
    out_ref : (1, Bt) lane-dense output row                (VMEM, f32)
    """
    bt, seq = idx_ref.shape
    vocab = w1e_ref.shape[0]

    viota = jax.lax.broadcasted_iota(jnp.int32, (bt, vocab), 1)          # (Bt, V)

    # Integer token histogram over the sequence axis, built in ONE pass over the
    # (Bt, V) accumulator: all S boolean masks summed as int32 in a single fused
    # expression (no per-step f32 convert, no per-step vld+vst of the accumulator).
    if seq <= 16:
        idx = idx_ref[...]                                               # (Bt, S)
        hist_i = functools.reduce(
            operator.add,
            [(viota == idx[:, s:s + 1]).astype(jnp.int32) for s in range(seq)])
    else:
        # Long sequences: bounded live ranges via fori_loop instead of S unrolled
        # (Bt, V) mask temps (avoids flipping the kernel to spill-bound).
        def body(s, acc):
            tok = idx_ref[:, pl.ds(s, 1)]                                # (Bt, 1)
            return acc + (viota == tok).astype(jnp.int32)
        hist_i = jax.lax.fori_loop(0, seq, body,
                                   jnp.zeros((bt, vocab), jnp.int32))

    # Counts are small integers (<= S), exactly representable in bf16, so this MXU
    # operand cast is lossless. The 1/S mean scale is applied AFTER the f32
    # accumulation, so it is exact for any S (not just powers of two).
    hist = hist_i.astype(w1e_ref.dtype)                                  # (Bt, V)

    # mean_emb @ w1 == (hist_counts @ (emb @ w1)) / S : one (Bt,V)@(V,H) MXU pass.
    h = jnp.dot(hist, w1e_ref[...],
                preferred_element_type=jnp.float32) * (1.0 / seq)        # (Bt, H) f32
    h = h + b1_ref[...]
    h = jnp.where(h > 0, h, 0.01 * h)                                    # leaky_relu(0.01)

    # fc2 (out_features = 1) on the VPU/XLU instead of an N=1 MXU matmul.
    out = jnp.sum(h * w2_ref[...], axis=-1) + b2_ref[0, 0]               # (Bt,)
    out_ref[...] = out.reshape(1, bt)                                    # lane-dense store


def prepare_fused_params(emb, w1, *, mxu_dtype=jnp.bfloat16):
    """Hoist the static embedding/fc1 fusion out of the per-call forward path.

    mean_emb @ w1 == (hist @ (emb @ w1)) / S, so the (V,E)@(E,H) product is
    precomputed once per parameter set. bf16 by default: halves the MXU-operand
    VMEM/DMA footprint and is required for full MXU rate on v6e/v7x.
    """
    return jnp.dot(emb, w1, preferred_element_type=jnp.float32).astype(mxu_dtype)


def _pick_b_tile(B):
    rup8 = lambda n: ((n + 7) // 8) * 8
    if B >= 512:
        return 256      # fill the 256-row MXU on v6e/v7x; grid still has >= 2 blocks
    if B > 128:
        return 128      # >= 2 grid blocks so v7x's 2nd TensorCore gets work
    return rup8(B)      # small batch: one sublane-rounded tile (block == full array)


def cost_prediction_forward(x, fused_w1, b1, w2, b2):
    """x: (B, S) int32 token ids. Returns (B,) f32 (PyTorch's out.squeeze()).

    Note: out-of-range token ids (< 0 or >= V) contribute zero to the histogram
    instead of raising like nn.Embedding would.
    """
    B, S = x.shape
    assert B > 0, "batch must be non-empty"
    V, H = fused_w1.shape

    b_tile = _pick_b_tile(B)
    n_blk = pl.cdiv(B, b_tile)
    b_pad = n_blk * b_tile
    if b_pad != B:
        x = jnp.pad(x, ((0, b_pad - B), (0, 0)))   # pad rows with token 0; sliced off

    out2d = pl.pallas_call(
        _cost_pred_kernel,
        out_shape=jax.ShapeDtypeStruct((1, b_pad), jnp.float32),
        grid=(n_blk,),
        in_specs=[
            pl.BlockSpec((b_tile, S), lambda i: (i, 0)),            # token-id tile
            pl.BlockSpec((V, H), lambda i: (0, 0)),                 # fused emb@w1 (resident)
            pl.BlockSpec((1, H), lambda i: (0, 0)),                 # fc1 bias
            pl.BlockSpec((1, H), lambda i: (0, 0)),                 # fc2 weight row
            pl.BlockSpec(memory_space=pltpu.MemorySpace.SMEM),      # fc2 bias scalar
        ],
        out_specs=pl.BlockSpec((1, b_tile), lambda i: (0, i)),
        compiler_params=pltpu.CompilerParams(
            dimension_semantics=("parallel",)),  # batch axis shards across v7x's 2 TCs
    )(x, fused_w1, b1, w2, b2)

    # (1, B_pad) -> PyTorch out.squeeze() semantics.
    return jnp.squeeze(out2d[:, :B])


def init_params(key, input_dim=INPUT_DIM, embedding_dim=EMBEDDING_DIM,
                hidden_dim=HIDDEN_DIM):
    k_emb, k_w1, k_b1, k_w2, k_b2 = jax.random.split(key, 5)
    # nn.Embedding default init: N(0, 1)
    emb = jax.random.normal(k_emb, (input_dim, embedding_dim), jnp.float32)
    # nn.Linear default init: U(-1/sqrt(fan_in), 1/sqrt(fan_in))
    lim1 = 1.0 / jnp.sqrt(embedding_dim)
    w1 = jax.random.uniform(k_w1, (embedding_dim, hidden_dim), jnp.float32, -lim1, lim1)
    b1 = jax.random.uniform(k_b1, (1, hidden_dim), jnp.float32, -lim1, lim1)
    lim2 = 1.0 / jnp.sqrt(hidden_dim)
    w2 = jax.random.uniform(k_w2, (1, hidden_dim), jnp.float32, -lim2, lim2)  # fc2.weight
    b2 = jax.random.uniform(k_b2, (1, 1), jnp.float32, -lim2, lim2)           # fc2.bias
    return emb, w1, b1, w2, b2


def reference_forward(x, emb, w1, b1, w2, b2):
    """Pure-JAX reference mirroring the PyTorch forward."""
    embedded = jnp.take(emb, x, axis=0).mean(axis=1)   # (B, E)
    h = embedded @ w1 + b1
    h = jnp.where(h > 0, h, 0.01 * h)
    out = h @ w2.T + b2                                # (B, 1)
    return jnp.squeeze(out)


if __name__ == "__main__":
    key = jax.random.PRNGKey(0)
    k_params, k_x = jax.random.split(key)

    B, S = 2, 8  # small batch of token-id sequences
    emb, w1, b1, w2, b2 = init_params(k_params)
    x = jax.random.randint(k_x, (B, S), 0, INPUT_DIM, dtype=jnp.int32)

    ref = reference_forward(x, emb, w1, b1, w2, b2)
    fwd = jax.jit(cost_prediction_forward)

    # f32 MXU-operand path: matches the f32 reference tightly.
    fused_f32 = prepare_fused_params(emb, w1, mxu_dtype=jnp.float32)
    out_f32 = jax.block_until_ready(fwd(x, fused_f32, b1, w2, b2))
    assert out_f32.shape == ref.shape == (B,)
    assert jnp.allclose(out_f32, ref, atol=1e-4, rtol=1e-4)

    # Default bf16 MXU-operand path (recommended on v6e/v7x): histogram counts are
    # exact in bf16, so only fused_w1's bf16 rounding contributes error.
    fused_bf16 = prepare_fused_params(emb, w1)
    out_bf16 = jax.block_until_ready(fwd(x, fused_bf16, b1, w2, b2))
    assert out_bf16.shape == (B,)
    assert jnp.allclose(out_bf16, ref, atol=5e-2, rtol=5e-2)

    print("KERNEL_OK")
</pallas_src>

<mosaic_0001>
module attributes {stable_mosaic.version = 11 : i64} {
  func.func @_cost_pred_kernel(%arg0: i32, %arg1: memref<8x8xi32, #tpu.memory_space<vmem>>, %arg2: memref<2048x64xf32, #tpu.memory_space<vmem>>, %arg3: memref<1x64xf32, #tpu.memory_space<vmem>>, %arg4: memref<1x64xf32, #tpu.memory_space<vmem>>, %arg5: memref<1x1xf32, #tpu.memory_space<smem>>, %arg6: memref<1x8xf32, #tpu.memory_space<vmem>>) attributes {dimension_semantics = [#tpu.dimension_semantics<parallel>], iteration_bounds = array<i64: 1>, scalar_prefetch = 0 : i64, scratch_operands = 0 : i64, tpu.core_type = #tpu.core_type<tc>, window_params = [{transform_indices = @transform_0, window_bounds = array<i64: 8, 8>}, {pipeline_mode = #tpu.pipeline_mode<synchronous>, transform_indices = @transform_1, window_bounds = array<i64: 2048, 64>}, {pipeline_mode = #tpu.pipeline_mode<synchronous>, transform_indices = @transform_2, window_bounds = array<i64: 1, 64>}, {pipeline_mode = #tpu.pipeline_mode<synchronous>, transform_indices = @transform_3, window_bounds = array<i64: 1, 64>}, {transform_indices = @transform_4, window_bounds = array<i64: 1, 1>}, {transform_indices = @transform_5, window_bounds = array<i64: 1, 8>}]} {
    %0 = tpu.iota {dimensions = array<i32: 1>} : vector<8x2048xi32>
    %c0 = arith.constant 0 : index
    %c0_0 = arith.constant 0 : index
    %1 = vector.load %arg1[%c0, %c0_0] : memref<8x8xi32, #tpu.memory_space<vmem>>, vector<8x8xi32>
    %2 = vector.extract_strided_slice %1 {offsets = [0, 0], sizes = [8, 1], strides = [1, 1]} : vector<8x8xi32> to vector<8x1xi32>
    %3 = vector.broadcast %2 : vector<8x1xi32> to vector<8x2048xi32>
    %4 = arith.cmpi eq, %0, %3 : vector<8x2048xi32>
    %5 = arith.extui %4 : vector<8x2048xi1> to vector<8x2048xi32>
    %6 = vector.extract_strided_slice %1 {offsets = [0, 1], sizes = [8, 1], strides = [1, 1]} : vector<8x8xi32> to vector<8x1xi32>
    %7 = vector.broadcast %6 : vector<8x1xi32> to vector<8x2048xi32>
    %8 = arith.cmpi eq, %0, %7 : vector<8x2048xi32>
    %9 = arith.extui %8 : vector<8x2048xi1> to vector<8x2048xi32>
    %10 = vector.extract_strided_slice %1 {offsets = [0, 2], sizes = [8, 1], strides = [1, 1]} : vector<8x8xi32> to vector<8x1xi32>
    %11 = vector.broadcast %10 : vector<8x1xi32> to vector<8x2048xi32>
    %12 = arith.cmpi eq, %0, %11 : vector<8x2048xi32>
    %13 = arith.extui %12 : vector<8x2048xi1> to vector<8x2048xi32>
    %14 = vector.extract_strided_slice %1 {offsets = [0, 3], sizes = [8, 1], strides = [1, 1]} : vector<8x8xi32> to vector<8x1xi32>
    %15 = vector.broadcast %14 : vector<8x1xi32> to vector<8x2048xi32>
    %16 = arith.cmpi eq, %0, %15 : vector<8x2048xi32>
    %17 = arith.extui %16 : vector<8x2048xi1> to vector<8x2048xi32>
    %18 = vector.extract_strided_slice %1 {offsets = [0, 4], sizes = [8, 1], strides = [1, 1]} : vector<8x8xi32> to vector<8x1xi32>
    %19 = vector.broadcast %18 : vector<8x1xi32> to vector<8x2048xi32>
    %20 = arith.cmpi eq, %0, %19 : vector<8x2048xi32>
    %21 = arith.extui %20 : vector<8x2048xi1> to vector<8x2048xi32>
    %22 = vector.extract_strided_slice %1 {offsets = [0, 5], sizes = [8, 1], strides = [1, 1]} : vector<8x8xi32> to vector<8x1xi32>
    %23 = vector.broadcast %22 : vector<8x1xi32> to vector<8x2048xi32>
    %24 = arith.cmpi eq, %0, %23 : vector<8x2048xi32>
    %25 = arith.extui %24 : vector<8x2048xi1> to vector<8x2048xi32>
    %26 = vector.extract_strided_slice %1 {offsets = [0, 6], sizes = [8, 1], strides = [1, 1]} : vector<8x8xi32> to vector<8x1xi32>
    %27 = vector.broadcast %26 : vector<8x1xi32> to vector<8x2048xi32>
    %28 = arith.cmpi eq, %0, %27 : vector<8x2048xi32>
    %29 = arith.extui %28 : vector<8x2048xi1> to vector<8x2048xi32>
    %30 = vector.extract_strided_slice %1 {offsets = [0, 7], sizes = [8, 1], strides = [1, 1]} : vector<8x8xi32> to vector<8x1xi32>
    %31 = vector.broadcast %30 : vector<8x1xi32> to vector<8x2048xi32>
    %32 = arith.cmpi eq, %0, %31 : vector<8x2048xi32>
    %33 = arith.extui %32 : vector<8x2048xi1> to vector<8x2048xi32>
    %34 = arith.addi %5, %9 : vector<8x2048xi32>
    %35 = arith.addi %34, %13 : vector<8x2048xi32>
    %36 = arith.addi %35, %17 : vector<8x2048xi32>
    %37 = arith.addi %36, %21 : vector<8x2048xi32>
    %38 = arith.addi %37, %25 : vector<8x2048xi32>
    %39 = arith.addi %38, %29 : vector<8x2048xi32>
    %40 = arith.addi %39, %33 : vector<8x2048xi32>
    %41 = arith.sitofp %40 : vector<8x2048xi32> to vector<8x2048xf32>
    %c0_1 = arith.constant 0 : index
    %c0_2 = arith.constant 0 : index
    %42 = vector.load %arg2[%c0_1, %c0_2] : memref<2048x64xf32, #tpu.memory_space<vmem>>, vector<2048x64xf32>
    %cst = arith.constant dense<0.000000e+00> : vector<8x64xf32>
    %43 = tpu.matmul %41, %42, %cst {dimension_numbers = #tpu.dot_dimension_numbers<[1], [0], [0], [1], [0, 0, 1, 1], [], []>} : vector<8x2048xf32>, vector<2048x64xf32>, vector<8x64xf32> -> vector<8x64xf32>
    %cst_3 = arith.constant 1.250000e-01 : f32
    %44 = vector.broadcast %cst_3 : f32 to vector<8x64xf32>
    %45 = arith.mulf %43, %44 : vector<8x64xf32>
    %c0_4 = arith.constant 0 : index
    %c0_5 = arith.constant 0 : index
    %46 = vector.load %arg3[%c0_4, %c0_5] : memref<1x64xf32, #tpu.memory_space<vmem>>, vector<1x64xf32>
    %47 = vector.broadcast %46 : vector<1x64xf32> to vector<8x64xf32>
    %48 = arith.addf %45, %47 : vector<8x64xf32>
    %cst_6 = arith.constant 0.000000e+00 : f32
    %49 = vector.broadcast %cst_6 : f32 to vector<8x64xf32>
    %50 = arith.cmpf ogt, %48, %49 : vector<8x64xf32>
    %cst_7 = arith.constant 0.00999999977 : f32
    %51 = vector.broadcast %cst_7 : f32 to vector<8x64xf32>
    %52 = arith.mulf %51, %48 : vector<8x64xf32>
    %53 = arith.select %50, %48, %52 : vector<8x64xi1>, vector<8x64xf32>
    %c0_8 = arith.constant 0 : index
    %c0_9 = arith.constant 0 : index
    %54 = vector.load %arg4[%c0_8, %c0_9] : memref<1x64xf32, #tpu.memory_space<vmem>>, vector<1x64xf32>
    %55 = vector.broadcast %54 : vector<1x64xf32> to vector<8x64xf32>
    %56 = arith.mulf %53, %55 : vector<8x64xf32>
    %cst_10 = arith.constant dense<0.000000e+00> : vector<8xf32>
    %57 = vector.multi_reduction <add>, %56, %cst_10 [1] : vector<8x64xf32> to vector<8xf32>
    %c0_11 = arith.constant 0 : index
    %c0_12 = arith.constant 0 : index
    %58 = memref.load %arg5[%c0_11, %c0_12] : memref<1x1xf32, #tpu.memory_space<smem>>
    %59 = vector.broadcast %58 : f32 to vector<8xf32>
    %60 = arith.addf %57, %59 : vector<8xf32>
    %61 = vector.shape_cast %60 : vector<8xf32> to vector<1x8xf32>
    %c0_13 = arith.constant 0 : index
    %c0_14 = arith.constant 0 : index
    %62 = vector.load %arg6[%c0_13, %c0_14] : memref<1x8xf32, #tpu.memory_space<vmem>>, vector<1x8xf32>
    tpu.vector_store %arg6[%c0_13, %c0_14], %61 {strides = array<i32>} : memref<1x8xf32, #tpu.memory_space<vmem>>, vector<1x8xf32>,
    return
  }
  func.func @transform_0(%arg0: i32) -> (i32, i32) {
    %c0_i32 = arith.constant 0 : i32
    %c0_i32_0 = arith.constant 0 : i32
    return %arg0, %c0_i32 : i32, i32
  }
  func.func @transform_1(%arg0: i32) -> (i32, i32) {
    %c0_i32 = arith.constant 0 : i32
    %c0_i32_0 = arith.constant 0 : i32
    %c0_i32_1 = arith.constant 0 : i32
    return %c0_i32, %c0_i32_0 : i32, i32
  }
  func.func @transform_2(%arg0: i32) -> (i32, i32) {
    %c0_i32 = arith.constant 0 : i32
    %c0_i32_0 = arith.constant 0 : i32
    %c0_i32_1 = arith.constant 0 : i32
    return %c0_i32, %c0_i32_0 : i32, i32
  }
  func.func @transform_3(%arg0: i32) -> (i32, i32) {
    %c0_i32 = arith.constant 0 : i32
    %c0_i32_0 = arith.constant 0 : i32
    %c0_i32_1 = arith.constant 0 : i32
    return %c0_i32, %c0_i32_0 : i32, i32
  }
  func.func @transform_4(%arg0: i32) -> (i32, i32) {
    %c0_i32 = arith.constant 0 : i32
    %c0_i32_0 = arith.constant 0 : i32
    %c0_i32_1 = arith.constant 0 : i32
    return %c0_i32, %c0_i32_0 : i32, i32
  }
  func.func @transform_5(%arg0: i32) -> (i32, i32) {
    %c0_i32 = arith.constant 0 : i32
    %c0_i32_0 = arith.constant 0 : i32
    return %c0_i32, %arg0 : i32, i32
  }
}

</mosaic_0001>

<bundles_post_ra>
// kernel: cost_prediction_forward.1
= control target key start
LH: loop header
LB: loop body
LE: loop exit
PB: predicated region body
PF: predicated region fallthrough
CT: control target
= control target key end

     0   :  { %v1857_v0 = vmov 2   ;;  %v3884_v1 = vmov 0   ;;  %v1859_v21 = vmov 3   ;;  %v1860_v22 = vmov 1   ;;  %s3877_s0 = inlined_call_operand.vmem [shape: s32[8,8], index: 0, kind: input, shape index: {}]   ;;  %s3878_s1 = inlined_call_operand.vmem [shape: f32[2048,64], index: 1, kind: input, shape index: {}]   ;;  %s3879_s2 = inlined_call_operand.vmem [shape: f32[1,64], index: 2, kind: input, shape index: {}]   ;;  %s3880_s3 = inlined_call_operand.vmem [shape: f32[1,64], index: 3, kind: input, shape index: {}]   ;;  %s3881_s4 = inlined_call_operand.<no memory space> [shape: f32[1,1], index: 4, kind: input, shape index: {}]   ;;  %s3882_s5 = inlined_call_operand.vmem [shape: f32[1,8], index: 5, kind: output, shape index: {}]  }
   0x1   :  { %1850 = vset.pattern.permute.xlu1 %v1857_v0  ;;  %1848 = vset.pattern.permute.xlu0 %v3884_v1  ;;  %v1899_v2 = vld [vmem:[%s3877_s0] sm:$0xff]  ;;  %v464_v4 = vld [vmem:[%s3878_s1 + $0x88] sm:$0xff]  ;;  %v465_v14 = vld [vmem:[%s3878_s1 + $0x90] sm:$0xff]  ;;  %v1861_v38 = vmov 4   ;;  %v1862_v39 = vmov 5   ;;  %v1863_v54 = vmov 6  }
   0x2   :  { %v463_v3 = vld [vmem:[%s3878_s1 + $0x80] sm:$0xff]  ;;  %110 = vperm.xlu1 %1850, %v1899_v2   ;;  %40 = vperm.xlu0 %1848, %v1899_v2   ;;  %v496_v6 = vld [vmem:[%s3878_s1 + $0x188] sm:$0xff]  ;;  %v466_v15 = vld [vmem:[%s3878_s1 + $0x98] sm:$0xff]  ;;  %v1864_v58 = vmov 7  }
   0x3   :  { %v495_v5 = vld [vmem:[%s3878_s1 + $0x180] sm:$0xff]  ;;  %v1584_v7 = vpack.c.bf16 %v464_v4, %v463_v3  ;;  %v448_v10 = vld [vmem:[%s3878_s1 + $0x8] sm:$0xff]  ;;  %v1588_v17 = vpack.c.bf16 %v466_v15, %v465_v14  ;;  %v497_v18 = vld [vmem:[%s3878_s1 + $0x190] sm:$0xff] }
   0x4   :  { %v1616_v8 = vpack.c.bf16 %v496_v6, %v495_v5  ;;  %v447_v9 = vld [vmem:[%s3878_s1] sm:$0xff]  ;;  %v480_v13 = vld [vmem:[%s3878_s1 + $0x108] sm:$0xff]  ;;  %v498_v19 = vld [vmem:[%s3878_s1 + $0x198] sm:$0xff] }
   0x5   :  { %v479_v11 = vld [vmem:[%s3878_s1 + $0x100] sm:$0xff]  ;;  %v1586_v12 = vpack.c.bf16 %v448_v10, %v447_v9  ;;  %1585 = vmatprep.subr.bf16.mxu0 %v1584_v7  ;;  %v449_v20 = vld [vmem:[%s3878_s1 + $0x10] sm:$0xff]  ;;  %v1620_v23 = vpack.c.bf16 %v498_v19, %v497_v18  ;;  %v450_v24 = vld [vmem:[%s3878_s1 + $0x18] sm:$0xff] }
   0x6   :  { %1617 = vmatprep.subr.bf16.mxu1 %v1616_v8  ;;  %v1618_v16 = vpack.c.bf16 %v480_v13, %v479_v11  ;;  %1851 = vset.pattern.permute.xlu1 %v1859_v21  ;;  %v481_v25 = vld [vmem:[%s3878_s1 + $0x110] sm:$0xff]  ;;  %v482_v26 = vld [vmem:[%s3878_s1 + $0x118] sm:$0xff]  ;;  %v467_v27 = vld [vmem:[%s3878_s1 + $0xa0] sm:$0xff]  ;;  %v1590_v31 = vpack.c.bf16 %v450_v24, %v449_v20 }
   0x7   :  { %1849 = vset.pattern.permute.xlu0 %v1860_v22  ;;  %145 = vperm.xlu1 %1851, %v1899_v2   ;;  %v468_v28 = vld [vmem:[%s3878_s1 + $0xa8] sm:$0xff]  ;;  %v499_v29 = vld [vmem:[%s3878_s1 + $0x1a0] sm:$0xff]  ;;  %v1622_v32 = vpack.c.bf16 %v482_v26, %v481_v25  ;;  %v469_v41 = vld [vmem:[%s3878_s1 + $0xb0] sm:$0xff] }
   0x8   :  { %75 = vperm.xlu0 %1849, %v1899_v2   ;;  %1587 = vmatpush3.bf16.msra.mxu0 %v1586_v12  ;;  %v500_v30 = vld [vmem:[%s3878_s1 + $0x1a8] sm:$0xff]  ;;  %v1592_v33 = vpack.c.bf16 %v468_v28, %v467_v27  ;;  %v451_v35 = vld [vmem:[%s3878_s1 + $0x20] sm:$0xff]  ;;  %v470_v42 = vld [vmem:[%s3878_s1 + $0xb8] sm:$0xff] }
   0x9   :  { %1619 = vmatpush3.bf16.msra.mxu1 %v1618_v16  ;;  %1589 = vmatprep.subr.bf16.mxu0 %v1588_v17  ;;  %v1624_v34 = vpack.c.bf16 %v500_v30, %v499_v29  ;;  %v452_v36 = vld [vmem:[%s3878_s1 + $0x28] sm:$0xff]  ;;  %v483_v37 = vld [vmem:[%s3878_s1 + $0x120] sm:$0xff]  ;;  %v501_v43 = vld [vmem:[%s3878_s1 + $0x1b0] sm:$0xff]  ;;  %v1596_v47 = vpack.c.bf16 %v470_v42, %v469_v41 }
   0xa   :  { %1621 = vmatprep.subr.bf16.mxu1 %v1620_v23  ;;  %v484_v40 = vld [vmem:[%s3878_s1 + $0x128] sm:$0xff]  ;;  %v502_v44 = vld [vmem:[%s3878_s1 + $0x1b8] sm:$0xff]  ;;  %v1594_v45 = vpack.c.bf16 %v452_v36, %v451_v35  ;;  %v453_v48 = vld [vmem:[%s3878_s1 + $0x30] sm:$0xff] }
   0xb   :  { %1852 = vset.pattern.permute.xlu1 %v1861_v38  ;;  %v1626_v46 = vpack.c.bf16 %v484_v40, %v483_v37  ;;  %v454_v49 = vld [vmem:[%s3878_s1 + $0x38] sm:$0xff]  ;;  %v1628_v50 = vpack.c.bf16 %v502_v44, %v501_v43  ;;  %v485_v51 = vld [vmem:[%s3878_s1 + $0x130] sm:$0xff]  ;;  %v471_v53 = vld [vmem:[%s3878_s1 + $0xc0] sm:$0xff] }
   0xc   :  { %1853 = vset.pattern.permute.xlu0 %v1862_v39  ;;  %180 = vperm.xlu1 %1852, %v1899_v2   ;;  %v486_v52 = vld [vmem:[%s3878_s1 + $0x138] sm:$0xff]  ;;  %v472_v55 = vld [vmem:[%s3878_s1 + $0xc8] sm:$0xff]  ;;  %v503_v56 = vld [vmem:[%s3878_s1 + $0x1c0] sm:$0xff]  ;;  %v1598_v59 = vpack.c.bf16 %v454_v49, %v453_v48  ;;  %v3883_v48 = vlaneseq }
   0xd   :  { %215 = vperm.xlu0 %1853, %v1899_v2   ;;  %1591 = vmatpush3.bf16.msra.mxu0 %v1590_v31  ;;  %v504_v57 = vld [vmem:[%s3878_s1 + $0x1c8] sm:$0xff]  ;;  %v1630_v60 = vpack.c.bf16 %v486_v52, %v485_v51  ;;  %v455_v61 = vld [vmem:[%s3878_s1 + $0x40] sm:$0xff]  ;;  %v1600_v0 = vpack.c.bf16 %v472_v55, %v471_v53  ;;  %v473_v5 = vld [vmem:[%s3878_s1 + $0xd0] sm:$0xff] }
   0xe   :  { %1623 = vmatpush3.bf16.msra.mxu1 %v1622_v32  ;;  %1593 = vmatprep.subr.bf16.mxu0 %v1592_v33  ;;  %v456_v62 = vld [vmem:[%s3878_s1 + $0x48] sm:$0xff]  ;;  %v487_v63 = vld [vmem:[%s3878_s1 + $0x140] sm:$0xff]  ;;  %v1632_v3 = vpack.c.bf16 %v504_v57, %v503_v56  ;;  %v474_v6 = vld [vmem:[%s3878_s1 + $0xd8] sm:$0xff]  ;;  %v2114_v49 = vand.u32 127, %v3883_v48 }
   0xf   :  { %1625 = vmatprep.subr.bf16.mxu1 %v1624_v34  ;;  %v488_v4 = vld [vmem:[%s3878_s1 + $0x148] sm:$0xff]  ;;  %v505_v7 = vld [vmem:[%s3878_s1 + $0x1d0] sm:$0xff]  ;;  %v506_v8 = vld [vmem:[%s3878_s1 + $0x1d8] sm:$0xff]  ;;  %v1602_v9 = vpack.c.bf16 %v456_v62, %v455_v61  ;;  %v1604_v11 = vpack.c.bf16 %v474_v6, %v473_v5 }
  0x10   :  { %1854 = vset.pattern.permute.xlu1 %v1863_v54  ;;  %v1634_v10 = vpack.c.bf16 %v488_v4, %v487_v63  ;;  %v457_v12 = vld [vmem:[%s3878_s1 + $0x50] sm:$0xff]  ;;  %v458_v13 = vld [vmem:[%s3878_s1 + $0x58] sm:$0xff]  ;;  %v1636_v15 = vpack.c.bf16 %v506_v8, %v505_v7  ;;  %v475_v16 = vld [vmem:[%s3878_s1 + $0xe0] sm:$0xff]  ;;  %v2210_v7 = vadd.s32 384, %v2114_v49  ;;  %v2213_v8 = vadd.s32 256, %v2114_v49 }
  0x11   :  { %1856 = vset.pattern.permute.xlu0 %v1864_v58  ;;  %250 = vperm.xlu1 %1854, %v1899_v2   ;;  %v489_v14 = vld [vmem:[%s3878_s1 + $0x150] sm:$0xff]  ;;  %v476_v17 = vld [vmem:[%s3878_s1 + $0xe8] sm:$0xff]  ;;  %v507_v18 = vld [vmem:[%s3878_s1 + $0x1e0] sm:$0xff]  ;;  %v1606_v20 = vpack.c.bf16 %v458_v13, %v457_v12 }
  0x12   :  { %1595 = vmatpush3.bf16.msra.mxu0 %v1594_v45  ;;  %1627 = vmatpush3.bf16.msra.mxu1 %v1626_v46  ;;  %v508_v19 = vld [vmem:[%s3878_s1 + $0x1e8] sm:$0xff]  ;;  %v1608_v22 = vpack.c.bf16 %v476_v17, %v475_v16  ;;  %v459_v23 = vld [vmem:[%s3878_s1 + $0x60] sm:$0xff]  ;;  %v477_v28 = vld [vmem:[%s3878_s1 + $0xf0] sm:$0xff]  ;;  %v2259_v17 = vadd.s32 896, %v2114_v49 }
  0x13   :  { %1597 = vmatprep.subr.bf16.mxu0 %v1596_v47  ;;  %1629 = vmatprep.subr.bf16.mxu1 %v1628_v50  ;;  %v460_v24 = vld [vmem:[%s3878_s1 + $0x68] sm:$0xff]  ;;  %v491_v25 = vld [vmem:[%s3878_s1 + $0x160] sm:$0xff]  ;;  %v1640_v26 = vpack.c.bf16 %v508_v19, %v507_v18  ;;  %v478_v29 = vld [vmem:[%s3878_s1 + $0xf8] sm:$0xff] }
  0x14   :  { %v492_v27 = vld [vmem:[%s3878_s1 + $0x168] sm:$0xff]  ;;  %v509_v30 = vld [vmem:[%s3878_s1 + $0x1f0] sm:$0xff]  ;;  %v510_v31 = vld [vmem:[%s3878_s1 + $0x1f8] sm:$0xff]  ;;  %v1610_v32 = vpack.c.bf16 %v460_v24, %v459_v23  ;;  %v1612_v34 = vpack.c.bf16 %v478_v29, %v477_v28  ;;  %v2292_v24 = vadd.s32 512, %v2114_v49 }
  0x15   :  { %1855 = vset.pattern.permute.xlu1 %v1864_v58  ;;  %v1642_v33 = vpack.c.bf16 %v492_v27, %v491_v25  ;;  %v461_v35 = vld [vmem:[%s3878_s1 + $0x70] sm:$0xff]  ;;  %v462_v36 = vld [vmem:[%s3878_s1 + $0x78] sm:$0xff]  ;;  %v1644_v38 = vpack.c.bf16 %v510_v31, %v509_v30  ;;  %v527_v40 = vld [vmem:[%s3878_s1 + $0x280] sm:$0xff]  ;;  %v2295_v25 = vadd.s32 768, %v2114_v49 }
  0x16   :  { %1599 = vmatpush3.bf16.msra.mxu0 %v1598_v59  ;;  %285 = vperm.xlu1 %1855, %v1899_v2   ;;  %v490_v2 = vld [vmem:[%s3878_s1 + $0x158] sm:$0xff]  ;;  %v493_v37 = vld [vmem:[%s3878_s1 + $0x170] sm:$0xff]  ;;  %v528_v41 = vld [vmem:[%s3878_s1 + $0x288] sm:$0xff]  ;;  %v1614_v44 = vpack.c.bf16 %v462_v36, %v461_v35  ;;  %v2342_v36 = vadd.s32 1152, %v2114_v49 }
  0x17   :  { %1631 = vmatpush3.bf16.msra.mxu1 %v1630_v60  ;;  %1601 = vmatprep.subr.bf16.mxu0 %v1600_v0  ;;  %v1638_v21 = vpack.c.bf16 %v490_v2, %v489_v14  ;;  %v494_v39 = vld [vmem:[%s3878_s1 + $0x178] sm:$0xff]  ;;  %v559_v42 = vld [vmem:[%s3878_s1 + $0x380] sm:$0xff]  ;;  %v560_v43 = vld [vmem:[%s3878_s1 + $0x388] sm:$0xff]  ;;  %v1648_v46 = vpack.c.bf16 %v528_v41, %v527_v40  ;;  %v2167_v60 = vadd.s32 128, %v2114_v49 }
  0x18   :  { %1633 = vmatprep.subr.bf16.mxu1 %v1632_v3  ;;  %v1646_v45 = vpack.c.bf16 %v494_v39, %v493_v37  ;;  %v1680_v47 = vpack.c.bf16 %v560_v43, %v559_v42  ;;  %v2119_v50 = vld [vmem:[%s3878_s1 + $0x200] sm:$0xff]  ;;  %v2124_v51 = vld [vmem:[%s3878_s1 + $0x208] sm:$0xff]  ;;  %v2139_v54 = vld [vmem:[%s3878_s1 + $0x290] sm:$0xff]  ;;  %3951 = vst [vmem:[#allocation19_spill] sm:$0xff] %v2342_v36  ;;  %v2345_v37 = vadd.s32 1408, %v2114_v49 }
  0x19   :  { %v2129_v52 = vld [vmem:[%s3878_s1 + $0x300] sm:$0xff]  ;;  %v2134_v53 = vld [vmem:[%s3878_s1 + $0x308] sm:$0xff]  ;;  %v2144_v55 = vld [vmem:[%s3878_s1 + $0x298] sm:$0xff] }
  0x1a   :  { %1603 = vmatpush3.bf16.msra.mxu0 %v1602_v9  ;;  %v2149_v56 = vld [vmem:[%s3878_s1 + $0x390] sm:$0xff]  ;;  %v2154_v57 = vld [vmem:[%s3878_s1 + $0x398] sm:$0xff]  ;;  %v2182_v63 = vld [vmem:[%s3878_s1 + $0x2a0] sm:$0xff]  ;;  %v2216_v9 = vadd.s32 640, %v2114_v49  ;;  %3952 = vst [vmem:[#allocation20_spill] sm:$0xff] %v2345_v37 }
  0x1b   :  { %1635 = vmatpush3.bf16.msra.mxu1 %v1634_v10  ;;  %1605 = vmatprep.subr.bf16.mxu0 %v1604_v11  ;;  %v2159_v58 = vld [vmem:[%s3878_s1 + $0x210] sm:$0xff]  ;;  %v2164_v59 = vld [vmem:[%s3878_s1 + $0x218] sm:$0xff]  ;;  %v2187_v0 = vld [vmem:[%s3878_s1 + $0x2a8] sm:$0xff] }
  0x1c   :  { %1637 = vmatprep.subr.bf16.mxu1 %v1636_v15  ;;  %v2172_v61 = vld [vmem:[%s3878_s1 + $0x310] sm:$0xff]  ;;  %v2177_v62 = vld [vmem:[%s3878_s1 + $0x318] sm:$0xff]  ;;  %v2192_v3 = vld [vmem:[%s3878_s1 + $0x3a0] sm:$0xff] }
  0x1d   :  { %3935 = vst [vmem:[#allocation3_spill] sm:$0xff] %v2172_v61  ;;  %3936 = vst [vmem:[#allocation4_spill] sm:$0xff] %v2177_v62  ;;  %v2197_v4 = vld [vmem:[%s3878_s1 + $0x3a8] sm:$0xff]  ;;  %v2202_v5 = vld [vmem:[%s3878_s1 + $0x220] sm:$0xff] }
  0x1e   :  { %1607 = vmatpush3.bf16.msra.mxu0 %v1606_v20  ;;  %3937 = vst [vmem:[#allocation5_spill] sm:$0xff] %v2192_v3  ;;  %3938 = vst [vmem:[#allocation6_spill] sm:$0xff] %v2197_v4  ;;  %v2207_v6 = vld [vmem:[%s3878_s1 + $0x228] sm:$0xff]  ;;  %v2221_v10 = vld [vmem:[%s3878_s1 + $0x320] sm:$0xff] }
  0x1f   :  { %1639 = vmatpush3.bf16.msra.mxu1 %v1638_v21  ;;  %1609 = vmatprep.subr.bf16.mxu0 %v1608_v22  ;;  %3939 = vst [vmem:[#allocation7_spill] sm:$0xff] %v2221_v10  ;;  %v2226_v11 = vld [vmem:[%s3878_s1 + $0x328] sm:$0xff]  ;;  %v2231_v12 = vld [vmem:[%s3878_s1 + $0x2b0] sm:$0xff]  ;;  %v2236_v13 = vld [vmem:[%s3878_s1 + $0x2b8] sm:$0xff] }
  0x20   :  { %1641 = vmatprep.subr.bf16.mxu1 %v1640_v26  ;;  %3940 = vst [vmem:[#allocation8_spill] sm:$0xff] %v2226_v11  ;;  %v2241_v14 = vld [vmem:[%s3878_s1 + $0x3b0] sm:$0xff]  ;;  %v2246_v15 = vld [vmem:[%s3878_s1 + $0x3b8] sm:$0xff]  ;;  %v2274_v20 = vld [vmem:[%s3878_s1 + $0x2c0] sm:$0xff] }
  0x21   :  { %3941 = vst [vmem:[#allocation9_spill] sm:$0xff] %v2241_v14  ;;  %3942 = vst [vmem:[#allocation10_spill] sm:$0xff] %v2246_v15  ;;  %v2251_v2 = vld [vmem:[%s3878_s1 + $0x230] sm:$0xff]  ;;  %v2256_v16 = vld [vmem:[%s3878_s1 + $0x238] sm:$0xff]  ;;  %v2489_v14 = vadd.s32 1280, %v2114_v49 }
  0x22   :  { %1611 = vmatpush3.bf16.msra.mxu0 %v1610_v32  ;;  %v2264_v18 = vld [vmem:[%s3878_s1 + $0x330] sm:$0xff]  ;;  %v2269_v19 = vld [vmem:[%s3878_s1 + $0x338] sm:$0xff]  ;;  %v2279_v21 = vld [vmem:[%s3878_s1 + $0x2c8] sm:$0xff] }
  0x23   :  { %1643 = vmatpush3.bf16.msra.mxu1 %v1642_v33  ;;  %1613 = vmatprep.subr.bf16.mxu0 %v1612_v34  ;;  %3943 = vst [vmem:[#allocation11_spill] sm:$0xff] %v2264_v18  ;;  %3944 = vst [vmem:[#allocation12_spill] sm:$0xff] %v2269_v19  ;;  %v2284_v22 = vld [vmem:[%s3878_s1 + $0x3c0] sm:$0xff]  ;;  %v2289_v23 = vld [vmem:[%s3878_s1 + $0x3c8] sm:$0xff] }
  0x24   :  { %1645 = vmatprep.subr.bf16.mxu1 %v1644_v38  ;;  %3945 = vst [vmem:[#allocation13_spill] sm:$0xff] %v2284_v22  ;;  %3946 = vst [vmem:[#allocation14_spill] sm:$0xff] %v2289_v23  ;;  %v2304_v28 = vld [vmem:[%s3878_s1 + $0x240] sm:$0xff]  ;;  %v2309_v29 = vld [vmem:[%s3878_s1 + $0x248] sm:$0xff] }
  0x25   :  { %v2314_v30 = vld [vmem:[%s3878_s1 + $0x340] sm:$0xff]  ;;  %v2319_v31 = vld [vmem:[%s3878_s1 + $0x348] sm:$0xff]  ;;  %v2324_v32 = vld [vmem:[%s3878_s1 + $0x2d0] sm:$0xff]  ;;  %3968 = vst [vmem:[#allocation36_spill] sm:$0xff] %v2489_v14 }
  0x26   :  { %1615 = vmatpush3.bf16.msra.mxu0 %v1614_v44  ;;  %3947 = vst [vmem:[#allocation15_spill] sm:$0xff] %v2314_v30  ;;  %3948 = vst [vmem:[#allocation16_spill] sm:$0xff] %v2319_v31  ;;  %v2329_v33 = vld [vmem:[%s3878_s1 + $0x2d8] sm:$0xff]  ;;  %v2334_v34 = vld [vmem:[%s3878_s1 + $0x3d0] sm:$0xff] }
  0x27   :  { %1647 = vmatpush3.bf16.msra.mxu1 %v1646_v45  ;;  %1649 = vmatprep.subr.bf16.mxu0 %v1648_v46  ;;  %3949 = vst [vmem:[#allocation17_spill] sm:$0xff] %v2334_v34  ;;  %v2339_v35 = vld [vmem:[%s3878_s1 + $0x3d8] sm:$0xff]  ;;  %v2356_v41 = vld [vmem:[%s3878_s1 + $0x250] sm:$0xff]  ;;  %v2376_v45 = vld [vmem:[%s3878_s1 + $0x2e0] sm:$0xff]  ;;  %v2546_v34 = vadd.s32 1664, %v2114_v49 }
  0x28   :  { %1681 = vmatprep.subr.bf16.mxu1 %v1680_v47  ;;  %3950 = vst [vmem:[#allocation18_spill] sm:$0xff] %v2339_v35  ;;  %3953 = vst [vmem:[#allocation21_spill] sm:$0xff] %v2356_v41  ;;  %v2361_v42 = vld [vmem:[%s3878_s1 + $0x258] sm:$0xff]  ;;  %v2366_v43 = vld [vmem:[%s3878_s1 + $0x350] sm:$0xff]  ;;  %v2384_v47 = vadd.s32 1024, %v2114_v49 }
  0x29   :  { %3954 = vst [vmem:[#allocation22_spill] sm:$0xff] %v2361_v42  ;;  %3955 = vst [vmem:[#allocation23_spill] sm:$0xff] %v2366_v43  ;;  %v2371_v44 = vld [vmem:[%s3878_s1 + $0x358] sm:$0xff]  ;;  %v2381_v46 = vld [vmem:[%s3878_s1 + $0x2e8] sm:$0xff] }
  0x2a   :  { %3956 = vst [vmem:[#allocation24_spill] sm:$0xff] %v2371_v44  ;;  %3957 = vst [vmem:[#allocation25_spill] sm:$0xff] %v2376_v45  ;;  %v2397_v38 = vld [vmem:[%s3878_s1 + $0x3e0] sm:$0xff]  ;;  %v2402_v26 = vld [vmem:[%s3878_s1 + $0x3e8] sm:$0xff] }
  0x2b   :  { %3958 = vst [vmem:[#allocation26_spill] sm:$0xff] %v2381_v46  ;;  %3959 = vst [vmem:[#allocation27_spill] sm:$0xff] %v2384_v47  ;;  %v2407_v48 = vld [vmem:[%s3878_s1 + $0x260] sm:$0xff]  ;;  %v2412_v27 = vld [vmem:[%s3878_s1 + $0x268] sm:$0xff] }
  0x2c   :  { %v2417_v40 = vld [vmem:[%s3878_s1 + $0x360] sm:$0xff]  ;;  %v2422_v39 = vld [vmem:[%s3878_s1 + $0x368] sm:$0xff]  ;;  %v2427_v1 = vld [vmem:[%s3878_s1 + $0x2f0] sm:$0xff]  ;;  %3977 = vst [vmem:[#allocation45_spill] sm:$0xff] %v2546_v34 }
  0x2d   :  { %3960 = vst [vmem:[#allocation28_spill] sm:$0xff] %v2417_v40  ;;  %3961 = vst [vmem:[#allocation29_spill] sm:$0xff] %v2422_v39  ;;  %v2432_v47 = vld [vmem:[%s3878_s1 + $0x2f8] sm:$0xff]  ;;  %v2445_v61 = vld [vmem:[%s3878_s1 + $0x3f0] sm:$0xff] }
  0x2e   :  { %3962 = vst [vmem:[#allocation30_spill] sm:$0xff] %v2445_v61  ;;  %v2450_v62 = vld [vmem:[%s3878_s1 + $0x3f8] sm:$0xff]  ;;  %v2455_v37 = vld [vmem:[%s3878_s1 + $0x270] sm:$0xff]  ;;  %v2481_v11 = vld [vmem:[%s3878_s1 + $0x480] sm:$0xff] }
  0x2f   :  { %3963 = vst [vmem:[#allocation31_spill] sm:$0xff] %v2450_v62  ;;  %3964 = vst [vmem:[#allocation32_spill] sm:$0xff] %v2455_v37  ;;  %v2460_v3 = vld [vmem:[%s3878_s1 + $0x278] sm:$0xff]  ;;  %v2465_v4 = vld [vmem:[%s3878_s1 + $0x370] sm:$0xff]  ;;  %v3984_v62 = vmov 0  }
  0x30   :  { %3965 = vst [vmem:[#allocation33_spill] sm:$0xff] %v2460_v3  ;;  %3966 = vst [vmem:[#allocation34_spill] sm:$0xff] %v2465_v4  ;;  %v2476_v10 = vld [vmem:[%s3878_s1 + $0x378] sm:$0xff]  ;;  %v2486_v36 = vld [vmem:[%s3878_s1 + $0x488] sm:$0xff] }
  0x31   :  { %3967 = vst [vmem:[#allocation35_spill] sm:$0xff] %v2476_v10  ;;  %v2502_v19 = vld [vmem:[%s3878_s1 + $0x580] sm:$0xff]  ;;  %v2507_v14 = vld [vmem:[%s3878_s1 + $0x588] sm:$0xff]  ;;  %v2538_v31 = vld [vmem:[%s3878_s1 + $0x490] sm:$0xff] }
  0x32   :  { %3969 = vst [vmem:[#allocation37_spill] sm:$0xff] %v2502_v19  ;;  %3970 = vst [vmem:[#allocation38_spill] sm:$0xff] %v2507_v14  ;;  %v2512_v22 = vld [vmem:[%s3878_s1 + $0x400] sm:$0xff]  ;;  %v2517_v23 = vld [vmem:[%s3878_s1 + $0x408] sm:$0xff] }
  0x33   :  { %3971 = vst [vmem:[#allocation39_spill] sm:$0xff] %v2512_v22  ;;  %3972 = vst [vmem:[#allocation40_spill] sm:$0xff] %v2517_v23  ;;  %v2522_v18 = vld [vmem:[%s3878_s1 + $0x500] sm:$0xff]  ;;  %v2533_v30 = vld [vmem:[%s3878_s1 + $0x508] sm:$0xff] }
  0x34   :  { %3973 = vst [vmem:[#allocation41_spill] sm:$0xff] %v2522_v18  ;;  %3974 = vst [vmem:[#allocation42_spill] sm:$0xff] %v2533_v30  ;;  %v2543_v15 = vld [vmem:[%s3878_s1 + $0x498] sm:$0xff]  ;;  %v2563_v34 = vld [vmem:[%s3878_s1 + $0x590] sm:$0xff] }
  0x35   :  { %3975 = vst [vmem:[#allocation43_spill] sm:$0xff] %v2538_v31  ;;  %3976 = vst [vmem:[#allocation44_spill] sm:$0xff] %v2543_v15  ;;  %v2568_v42 = vld [vmem:[%s3878_s1 + $0x598] sm:$0xff]  ;;  %v2573_v44 = vld [vmem:[%s3878_s1 + $0x410] sm:$0xff] }
  0x36   :  { %3978 = vst [vmem:[#allocation46_spill] sm:$0xff] %v2563_v34  ;;  %3979 = vst [vmem:[#allocation47_spill] sm:$0xff] %v2568_v42  ;;  %v2586_v40 = vld [vmem:[%s3878_s1 + $0x418] sm:$0xff]  ;;  %v2591_v39 = vld [vmem:[%s3878_s1 + $0x510] sm:$0xff] }
  0x37   :  { %3980 = vst [vmem:[#allocation48_spill] sm:$0xff] %v2573_v44  ;;  %3981 = vst [vmem:[#allocation49_spill] sm:$0xff] %v2586_v40  ;;  %v2596_v46 = vld [vmem:[%s3878_s1 + $0x518] sm:$0xff] }
  0x38   :  { %3982 = vst [vmem:[#allocation50_spill] sm:$0xff] %v2591_v39  ;;  %3983 = vst [vmem:[#allocation51_spill] sm:$0xff] %v2596_v46 }
  0x81   :  { %v2548_v43 = vpop.permute.xlu1 %110  ;;  %v2550_v35 = vpop.permute.xlu0 %40 }
  0x82   :  { %vm43_vm0 = vcmp.eq.s32.totalorder %v2167_v60, %v2550_v35  ;;  %vm113_vm1 = vcmp.eq.s32.totalorder %v2167_v60, %v2548_v43  ;;  %vm45_vm2 = vcmp.eq.s32.totalorder %v2210_v7, %v2550_v35  ;;  %vm115_vm3 = vcmp.eq.s32.totalorder %v2210_v7, %v2548_v43 }
  0x83   :  { %v59_v37 = vsel %vm43_vm0, 1, %v3984_v62  ;;  %v129_v10 = vsel %vm113_vm1, 1, %v3984_v62  ;;  %v61_v18 = vsel %vm45_vm2, 1, %v3984_v62  ;;  %v131_v61 = vsel %vm115_vm3, 1, %v3984_v62 }
  0x84   :  { %vm42_vm4 = vcmp.eq.s32.totalorder %v2114_v49, %v2550_v35  ;;  %vm112_vm9 = vcmp.eq.s32.totalorder %v2114_v49, %v2548_v43  ;;  %vm44_vm10 = vcmp.eq.s32.totalorder %v2213_v8, %v2550_v35  ;;  %vm114_vm12 = vcmp.eq.s32.totalorder %v2213_v8, %v2548_v43 }
  0x85   :  { %v58_v42 = vsel %vm42_vm4, 1, %v3984_v62 }
  0x86   :  { %v2621_v19 = vpop.permute.xlu1 %145 }
  0x87   :  { %v2623_v4 = vpop.permute.xlu0 %75  ;;  %vm148_vm6 = vcmp.eq.s32.totalorder %v2167_v60, %v2621_v19  ;;  %vm150_vm8 = vcmp.eq.s32.totalorder %v2210_v7, %v2621_v19  ;;  %vm147_vm13 = vcmp.eq.s32.totalorder %v2114_v49, %v2621_v19 }
  0x88   :  { %vm78_vm5 = vcmp.eq.s32.totalorder %v2167_v60, %v2623_v4  ;;  %vm80_vm7 = vcmp.eq.s32.totalorder %v2210_v7, %v2623_v4  ;;  %vm77_vm11 = vcmp.eq.s32.totalorder %v2114_v49, %v2623_v4  ;;  %v164_v46 = vsel %vm148_vm6, 1, %v3984_v62 }
  0x89   :  { %v94_v41 = vsel %vm78_vm5, 1, %v3984_v62  ;;  %v96_v3 = vsel %vm80_vm7, 1, %v3984_v62  ;;  %v166_v34 = vsel %vm150_vm8, 1, %v3984_v62  ;;  %v93_v30 = vsel %vm77_vm11, 1, %v3984_v62 }
  0x8a   :  { %v320_v45 = vadd.s32 %v94_v41, %v59_v37  ;;  %v322_v39 = vadd.s32 %v96_v3, %v61_v18  ;;  %v319_v18 = vadd.s32 %v93_v30, %v58_v42  ;;  %vm79_vm2 = vcmp.eq.s32.totalorder %v2213_v8, %v2623_v4 }
  0x8b   :  { %v2652_v44 = vpop.permute.xlu1 %180  ;;  %v128_v42 = vsel %vm112_vm9, 1, %v3984_v62  ;;  %v95_v15 = vsel %vm79_vm2, 1, %v3984_v62  ;;  %vm47_vm8 = vcmp.eq.s32.totalorder %v2216_v9, %v2550_v35  ;;  %vm117_vm9 = vcmp.eq.s32.totalorder %v2216_v9, %v2548_v43 }
  0x8c   :  { %v2654_v40 = vpop.permute.xlu0 %215  ;;  %v336_v37 = vadd.s32 %v320_v45, %v129_v10  ;;  %v338_v3 = vadd.s32 %v322_v39, %v131_v61  ;;  %vm183_vm14 = vcmp.eq.s32.totalorder %v2167_v60, %v2652_v44  ;;  %vm185_vm0 = vcmp.eq.s32.totalorder %v2210_v7, %v2652_v44 }
  0x8d   :  { %vm218_vm15 = vcmp.eq.s32.totalorder %v2167_v60, %v2654_v40  ;;  %vm220_vm1 = vcmp.eq.s32.totalorder %v2210_v7, %v2654_v40  ;;  %v199_v41 = vsel %vm183_vm14, 1, %v3984_v62  ;;  %v201_v61 = vsel %vm185_vm0, 1, %v3984_v62 }
  0x8e   :  { %v352_v10 = vadd.s32 %v336_v37, %v164_v46  ;;  %v234_v30 = vsel %vm218_vm15, 1, %v3984_v62  ;;  %v354_v39 = vadd.s32 %v338_v3, %v166_v34  ;;  %v60_v45 = vsel %vm44_vm10, 1, %v3984_v62 }
  0x8f   :  { %v236_v46 = vsel %vm220_vm1, 1, %v3984_v62  ;;  %vm182_vm3 = vcmp.eq.s32.totalorder %v2114_v49, %v2652_v44  ;;  %v335_v37 = vadd.s32 %v319_v18, %v128_v42  ;;  %v163_v3 = vsel %vm147_vm13, 1, %v3984_v62 }
  0x90   :  { %v368_v14 = vadd.s32 %v352_v10, %v199_v41  ;;  %v2682_v31 = vpop.permute.xlu1 %250  ;;  %v370_v34 = vadd.s32 %v354_v39, %v201_v61  ;;  %v130_v41 = vsel %vm114_vm12, 1, %v3984_v62  ;;  %vm217_vm6 = vcmp.eq.s32.totalorder %v2114_v49, %v2654_v40 }
  0x91   :  { %vm253_vm4 = vcmp.eq.s32.totalorder %v2167_v60, %v2682_v31  ;;  %vm255_vm5 = vcmp.eq.s32.totalorder %v2210_v7, %v2682_v31  ;;  %v198_v39 = vsel %vm182_vm3, 1, %v3984_v62  ;;  %vm252_vm7 = vcmp.eq.s32.totalorder %v2114_v49, %v2682_v31 }
  0x92   :  { %v384_v10 = vadd.s32 %v368_v14, %v234_v30  ;;  %v269_v18 = vsel %vm253_vm4, 1, %v3984_v62  ;;  %v386_v61 = vadd.s32 %v370_v34, %v236_v46  ;;  %v271_v42 = vsel %vm255_vm5, 1, %v3984_v62 }
  0x93   :  { %v351_v22 = vadd.s32 %v335_v37, %v163_v3  ;;  %v233_v14 = vsel %vm217_vm6, 1, %v3984_v62  ;;  %vm149_vm10 = vcmp.eq.s32.totalorder %v2213_v8, %v2621_v19  ;;  %vm184_vm11 = vcmp.eq.s32.totalorder %v2213_v8, %v2652_v44 }
  0x94   :  { %v321_v30 = vadd.s32 %v95_v15, %v60_v45  ;;  %v400_v34 = vadd.s32 %v384_v10, %v269_v18  ;;  %v268_v37 = vsel %vm252_vm7, 1, %v3984_v62  ;;  %vm219_vm12 = vcmp.eq.s32.totalorder %v2213_v8, %v2654_v40 }
  0x95   :  { %v2713_v46 = vpop.permute.xlu1 %285  ;;  %v367_v3 = vadd.s32 %v351_v22, %v198_v39  ;;  %v402_v23 = vadd.s32 %v386_v61, %v271_v42  ;;  %vm49_vm0 = vcmp.eq.s32.totalorder %v2259_v17, %v2550_v35  ;;  %vm82_vm1 = vcmp.eq.s32.totalorder %v2216_v9, %v2623_v4 }
  0x96   :  { %vm288_vm13 = vcmp.eq.s32.totalorder %v2167_v60, %v2713_v46  ;;  %vm290_vm14 = vcmp.eq.s32.totalorder %v2210_v7, %v2713_v46  ;;  %vm287_vm15 = vcmp.eq.s32.totalorder %v2114_v49, %v2713_v46  ;;  %v337_v7 = vadd.s32 %v321_v30, %v130_v41 }
  0x97   :  { %v304_v15 = vsel %vm288_vm13, 1, %v3984_v62  ;;  %v306_v22 = vsel %vm290_vm14, 1, %v3984_v62  ;;  %v383_v45 = vadd.s32 %v367_v3, %v233_v14  ;;  %v303_v18 = vsel %vm287_vm15, 1, %v3984_v62 }
  0x98   :  { %v416_v10 = vadd.s32 %v400_v34, %v304_v15  ;;  %v418_v60 = vadd.s32 %v402_v23, %v306_v22  ;;  %v165_v39 = vsel %vm149_vm10, 1, %v3984_v62  ;;  %v200_v42 = vsel %vm184_vm11, 1, %v3984_v62 }
  0x99   :  { %v399_v61 = vadd.s32 %v383_v45, %v268_v37  ;;  %vm254_vm2 = vcmp.eq.s32.totalorder %v2213_v8, %v2682_v31  ;;  %v353_v23 = vadd.s32 %v337_v7, %v165_v39  ;;  %v98_v3 = vsel %vm82_vm1, 1, %v3984_v62 }
  0x9a   :  { %v432_v14 = vcvt.s32.f32 %v416_v10  ;;  %v434_v34 = vcvt.s32.f32 %v418_v60  ;;  %v235_v30 = vsel %vm219_vm12, 1, %v3984_v62  ;;  %vm289_vm3 = vcmp.eq.s32.totalorder %v2213_v8, %v2713_v46 }
  0x9b   :  { %v415_v41 = vadd.s32 %v399_v61, %v303_v18  ;;  %v63_v37 = vsel %vm47_vm8, 1, %v3984_v62  ;;  %v270_v15 = vsel %vm254_vm2, 1, %v3984_v62  ;;  %v369_v22 = vadd.s32 %v353_v23, %v200_v42 }
  0x9c   :  { %767 = vmatprep.mubr.f32.mxu0 %v432_v14  ;;  %837 = vmatprep.mubr.f32.mxu1 %v434_v34  ;;  %vm152_vm4 = vcmp.eq.s32.totalorder %v2216_v9, %v2621_v19  ;;  %vm187_vm5 = vcmp.eq.s32.totalorder %v2216_v9, %v2652_v44  ;;  %vm222_vm6 = vcmp.eq.s32.totalorder %v2216_v9, %v2654_v40  ;;  %v133_v18 = vsel %vm117_vm9, 1, %v3984_v62 }
  0x9d   :  { %v431_v45 = vcvt.s32.f32 %v415_v41  ;;  %vm257_vm7 = vcmp.eq.s32.totalorder %v2216_v9, %v2682_v31  ;;  %v324_v10 = vadd.s32 %v98_v3, %v63_v37  ;;  %v385_v60 = vadd.s32 %v369_v22, %v235_v30 }
  0x9e   :  { %vm84_vm8 = vcmp.eq.s32.totalorder %v2259_v17, %v2623_v4  ;;  %vm119_vm10 = vcmp.eq.s32.totalorder %v2259_v17, %v2548_v43  ;;  %v305_v7 = vsel %vm289_vm3, 1, %v3984_v62  ;;  %v168_v61 = vsel %vm152_vm4, 1, %v3984_v62 }
  0x9f   :  { %768 = vmatmul.mubr.f32.vlgmr.msra.gmra.mrb[0].mxu0 %v431_v45  ;;  %v340_v39 = vadd.s32 %v324_v10, %v133_v18  ;;  %v100_v42 = vsel %vm84_vm8, 1, %v3984_v62  ;;  %v401_v14 = vadd.s32 %v385_v60, %v270_v15  ;;  %v3985_v34 = vpack.c.bf16 %v2124_v51, %v2119_v50 }
  0xa0   :  { %v203_v23 = vsel %vm187_vm5, 1, %v3984_v62  ;;  %v238_v3 = vsel %vm222_vm6, 1, %v3984_v62  ;;  %v273_v8 = vsel %vm257_vm7, 1, %v3984_v62  ;;  %vm292_vm9 = vcmp.eq.s32.totalorder %v2216_v9, %v2713_v46 }
  0xa1   :  { %1651 = vmatpush3.bf16.msra.mxu0 %v3985_v34  ;;  %v356_v41 = vadd.s32 %v340_v39, %v168_v61  ;;  %v65_v30 = vsel %vm49_vm0, 1, %v3984_v62  ;;  %vm154_vm11 = vcmp.eq.s32.totalorder %v2259_v17, %v2621_v19  ;;  %v3986_v50 = vpack.c.bf16 %v2144_v55, %v2139_v54 }
  0xa2   :  { %v417_v51 = vadd.s32 %v401_v14, %v305_v7  ;;  %v135_v37 = vsel %vm119_vm10, 1, %v3984_v62  ;;  %vm189_vm12 = vcmp.eq.s32.totalorder %v2259_v17, %v2652_v44  ;;  %v326_v15 = vadd.s32 %v100_v42, %v65_v30  ;;  %v2884_v30 = vld [vmem:[%s3878_s1 + $0x5a8] sm:$0xff] }
  0xa3   :  { %1653 = vmatprep.subr.bf16.mxu0 %v3986_v50  ;;  %v372_v22 = vadd.s32 %v356_v41, %v203_v23  ;;  %vm224_vm13 = vcmp.eq.s32.totalorder %v2259_v17, %v2654_v40  ;;  %vm46_vm14 = vcmp.eq.s32.totalorder %v2292_v24, %v2550_v35  ;;  %vm81_vm15 = vcmp.eq.s32.totalorder %v2292_v24, %v2623_v4 }
  0xa4   :  { %v433_v54 = vcvt.s32.f32 %v417_v51  ;;  %v170_v55 = vsel %vm154_vm11, 1, %v3984_v62  ;;  %v342_v45 = vadd.s32 %v326_v15, %v135_v37  ;;  %v3987_v10 = vpack.c.bf16 %v2164_v59, %v2159_v58  ;;  %v3993_v37 = vld [vmem:[#allocation4_spill] sm:$0xff]  ;;  %v3994_v15 = vld [vmem:[#allocation3_spill] sm:$0xff] }
  0xa5   :  { %v97_v60 = vsel %vm81_vm15, 1, %v3984_v62  ;;  %v388_v18 = vadd.s32 %v372_v22, %v238_v3  ;;  %v205_v7 = vsel %vm189_vm12, 1, %v3984_v62  ;;  %vm259_vm0 = vcmp.eq.s32.totalorder %v2259_v17, %v2682_v31 }
  0xa6   :  { %1655 = vmatpush3.bf16.msra.mxu0 %v3987_v10  ;;  %v3988_v61 = vpack.c.bf16 %v2187_v0, %v2182_v63  ;;  %vm116_vm1 = vcmp.eq.s32.totalorder %v2292_v24, %v2548_v43  ;;  %838 = vmatmul.mubr.f32.vlgmr.msra.gmra.mrb[0].mxu1 %v433_v54  ;;  %v308_v58 = vsel %vm292_vm9, 1, %v3984_v62  ;;  %v240_v59 = vsel %vm224_vm13, 1, %v3984_v62  ;;  %v3996_v10 = vld [vmem:[#allocation6_spill] sm:$0xff] }
  0xa7   :  { %v358_v39 = vadd.s32 %v342_v45, %v170_v55  ;;  %v62_v42 = vsel %vm46_vm14, 1, %v3984_v62  ;;  %v3989_v63 = vpack.c.bf16 %v2134_v53, %v2129_v52  ;;  %v404_v0 = vadd.s32 %v388_v18, %v273_v8 }
  0xa8   :  { %1657 = vmatprep.subr.bf16.mxu0 %v3988_v61  ;;  %vm151_vm2 = vcmp.eq.s32.totalorder %v2292_v24, %v2621_v19  ;;  %vm186_vm3 = vcmp.eq.s32.totalorder %v2292_v24, %v2652_v44  ;;  %v323_v9 = vadd.s32 %v97_v60, %v62_v42  ;;  %v275_v14 = vsel %vm259_vm0, 1, %v3984_v62  ;;  %v3997_v60 = vld [vmem:[#allocation5_spill] sm:$0xff]  ;;  %v2907_v61 = vld [vmem:[%s3878_s1 + $0x420] sm:$0xff] }
  0xa9   :  { %1683 = vmatpush3.bf16.msra.mxu1 %v3989_v63  ;;  %vm294_vm4 = vcmp.eq.s32.totalorder %v2259_v17, %v2713_v46  ;;  %v374_v34 = vadd.s32 %v358_v39, %v205_v7  ;;  %v3990_v23 = vpack.c.bf16 %v2154_v57, %v2149_v56  ;;  %v3991_v52 = vpack.c.bf16 %v2207_v6, %v2202_v5  ;;  %v2859_v56 = vld [vmem:[%s3878_s1 + $0x4a0] sm:$0xff]  ;;  %v2864_v57 = vld [vmem:[%s3878_s1 + $0x4a8] sm:$0xff] }
  0xaa   :  { %v132_v53 = vsel %vm116_vm1, 1, %v3984_v62  ;;  %v420_v3 = vadd.s32 %v404_v0, %v308_v58  ;;  %v3992_v8 = vpack.c.bf16 %v2236_v13, %v2231_v12  ;;  %vm221_vm5 = vcmp.eq.s32.totalorder %v2292_v24, %v2654_v40  ;;  %v2879_v13 = vld [vmem:[%s3878_s1 + $0x5a0] sm:$0xff]  ;;  %v2912_v58 = vld [vmem:[%s3878_s1 + $0x428] sm:$0xff] }
  0xab   :  { %1685 = vmatprep.subr.bf16.mxu1 %v3990_v23  ;;  %1659 = vmatpush3.bf16.msra.mxu0 %v3991_v52  ;;  %v339_v41 = vadd.s32 %v323_v9, %v132_v53  ;;  %vm83_vm6 = vcmp.eq.s32.totalorder %v2295_v25, %v2623_v4  ;;  %v390_v5 = vadd.s32 %v374_v34, %v240_v59  ;;  %v167_v6 = vsel %vm151_vm2, 1, %v3984_v62  ;;  %v4001_v9 = vld [vmem:[#allocation8_spill] sm:$0xff]  ;;  %v4004_v52 = vld [vmem:[#allocation19_spill] sm:$0xff] }
  0xac   :  { %1661 = vmatprep.subr.bf16.mxu0 %v3992_v8  ;;  %v202_v12 = vsel %vm186_vm3, 1, %v3984_v62  ;;  %vm48_vm7 = vcmp.eq.s32.totalorder %v2295_v25, %v2550_v35  ;;  %v436_v50 = vcvt.s32.f32 %v420_v3  ;;  %v310_v51 = vsel %vm294_vm4, 1, %v3984_v62  ;;  %v2955_v3 = vld [vmem:[%s3878_s1 + $0x528] sm:$0xff]  ;;  %v2960_v8 = vld [vmem:[%s3878_s1 + $0x4b0] sm:$0xff] }
  0xad   :  { %v3995_v22 = vpack.c.bf16 %v3993_v37, %v3994_v15  ;;  %v355_v54 = vadd.s32 %v339_v41, %v167_v6  ;;  %v99_v55 = vsel %vm83_vm6, 1, %v3984_v62  ;;  %v406_v45 = vadd.s32 %v390_v5, %v275_v14  ;;  %v4002_v14 = vld [vmem:[#allocation7_spill] sm:$0xff]  ;;  %v2965_v41 = vld [vmem:[%s3878_s1 + $0x4b8] sm:$0xff] }
  0xae   :  { %v3998_v18 = vpack.c.bf16 %v3996_v10, %v3997_v60  ;;  %v3999_v7 = vpack.c.bf16 %v2256_v16, %v2251_v2  ;;  %vm118_vm8 = vcmp.eq.s32.totalorder %v2295_v25, %v2548_v43  ;;  %v1720_v17 = vpack.c.bf16 %v2864_v57, %v2859_v56  ;;  %907 = vmatprep.mubr.f32.mxu0 %v436_v50  ;;  %v4005_v6 = vld [vmem:[#allocation10_spill] sm:$0xff]  ;;  %v4010_v60 = vld [vmem:[#allocation12_spill] sm:$0xff]  ;;  %v3298_v56 = vld [vmem:[%s3878_s1 + $0x4e0] sm:$0xff] }
  0xaf   :  { %1687 = vmatpush3.bf16.msra.mxu1 %v3995_v22  ;;  %v2915_v59 = vadd.s32 1920, %v2114_v49  ;;  %v4000_v2 = vpack.c.bf16 %v2279_v21, %v2274_v20  ;;  %v237_v16 = vsel %vm221_vm5, 1, %v3984_v62  ;;  %v371_v39 = vadd.s32 %v355_v54, %v202_v12  ;;  %v2937_v21 = vld [vmem:[%s3878_s1 + $0x520] sm:$0xff]  ;;  %v4006_v12 = vld [vmem:[#allocation9_spill] sm:$0xff]  ;;  %v2983_v54 = vld [vmem:[%s3878_s1 + $0x5b8] sm:$0xff] }
  0xb0   :  { %1689 = vmatprep.subr.bf16.mxu1 %v3998_v18  ;;  %1663 = vmatpush3.bf16.msra.mxu0 %v3999_v7  ;;  %v64_v42 = vsel %vm48_vm7, 1, %v3984_v62  ;;  %v1752_v63 = vpack.c.bf16 %v2884_v30, %v2879_v13  ;;  %v422_v0 = vadd.s32 %v406_v45, %v310_v51  ;;  %vm256_vm10 = vcmp.eq.s32.totalorder %v2292_v24, %v2682_v31  ;;  %v2978_v22 = vld [vmem:[%s3878_s1 + $0x5b0] sm:$0xff]  ;;  %v4011_v18 = vld [vmem:[#allocation11_spill] sm:$0xff] }
  0xb1   :  { %1665 = vmatprep.subr.bf16.mxu0 %v4000_v2  ;;  %vm153_vm9 = vcmp.eq.s32.totalorder %v2295_v25, %v2621_v19  ;;  %v325_v20 = vadd.s32 %v99_v55, %v64_v42  ;;  %v4003_v34 = vpack.c.bf16 %v4001_v9, %v4002_v14  ;;  %vm291_vm11 = vcmp.eq.s32.totalorder %v2292_v24, %v2713_v46  ;;  %v4013_v42 = vld [vmem:[#allocation14_spill] sm:$0xff]  ;;  %v4017_v14 = vld [vmem:[#allocation21_spill] sm:$0xff] }
  0xb2   :  { %v134_v23 = vsel %vm118_vm8, 1, %v3984_v62  ;;  %vm86_vm12 = vcmp.eq.s32.totalorder %v4004_v52, %v2623_v4  ;;  %v1722_v53 = vpack.c.bf16 %v2912_v58, %v2907_v61  ;;  %v438_v5 = vcvt.s32.f32 %v422_v0  ;;  %v4014_v0 = vld [vmem:[#allocation13_spill] sm:$0xff]  ;;  %v4016_v9 = vld [vmem:[#allocation22_spill] sm:$0xff] }
  0xb3   :  { %1691 = vmatpush3.bf16.msra.mxu1 %v4003_v34  ;;  %v4007_v50 = vpack.c.bf16 %v4005_v6, %v4006_v12  ;;  %v4008_v51 = vpack.c.bf16 %v2309_v29, %v2304_v28  ;;  %v387_v37 = vadd.s32 %v371_v39, %v237_v16  ;;  %vm188_vm13 = vcmp.eq.s32.totalorder %v2295_v25, %v2652_v44  ;;  %v4019_v6 = vld [vmem:[#allocation26_spill] sm:$0xff]  ;;  %v4020_v12 = vld [vmem:[#allocation25_spill] sm:$0xff] }
  0xb4   :  { %v341_v15 = vadd.s32 %v325_v20, %v134_v23  ;;  %v4009_v55 = vpack.c.bf16 %v2329_v33, %v2324_v32  ;;  %v272_v28 = vsel %vm256_vm10, 1, %v3984_v62  ;;  %v169_v29 = vsel %vm153_vm9, 1, %v3984_v62  ;;  %977 = vmatprep.mubr.f32.mxu1 %v438_v5  ;;  %v4059_v39 = vld [vmem:[#allocation49_spill] sm:$0xff]  ;;  %v4060_v33 = vld [vmem:[#allocation48_spill] sm:$0xff] }
  0xb5   :  { %1693 = vmatprep.subr.bf16.mxu1 %v4007_v50  ;;  %1667 = vmatpush3.bf16.msra.mxu0 %v4008_v51  ;;  %vm223_vm14 = vcmp.eq.s32.totalorder %v2295_v25, %v2654_v40  ;;  %vm51_vm15 = vcmp.eq.s32.totalorder %v4004_v52, %v2550_v35  ;;  %v102_v32 = vsel %vm86_vm12, 1, %v3984_v62  ;;  %v1724_v10 = vpack.c.bf16 %v2965_v41, %v2960_v8 }
  0xb6   :  { %1669 = vmatprep.subr.bf16.mxu0 %v4009_v55  ;;  %v357_v45 = vadd.s32 %v341_v15, %v169_v29  ;;  %v4012_v7 = vpack.c.bf16 %v4010_v60, %v4011_v18  ;;  %v307_v2 = vsel %vm291_vm11, 1, %v3984_v62  ;;  %v204_v16 = vsel %vm188_vm13, 1, %v3984_v62  ;;  %v4024_v29 = vld [vmem:[#allocation15_spill] sm:$0xff] }
  0xb7   :  { %vm121_vm0 = vcmp.eq.s32.totalorder %v4004_v52, %v2548_v43  ;;  %v4015_v20 = vpack.c.bf16 %v4013_v42, %v4014_v0  ;;  %v4018_v34 = vpack.c.bf16 %v4016_v9, %v4017_v14  ;;  %v403_v24 = vadd.s32 %v387_v37, %v272_v28  ;;  %v4022_v37 = vld [vmem:[#allocation20_spill] sm:$0xff] }
  0xb8   :  { %1695 = vmatpush3.bf16.msra.mxu1 %v4012_v7  ;;  %v239_v23 = vsel %vm223_vm14, 1, %v3984_v62  ;;  %vm258_vm1 = vcmp.eq.s32.totalorder %v2295_v25, %v2682_v31  ;;  %v67_v5 = vsel %vm51_vm15, 1, %v3984_v62  ;;  %v4021_v50 = vpack.c.bf16 %v4019_v6, %v4020_v12  ;;  %v4023_v28 = vld [vmem:[#allocation16_spill] sm:$0xff]  ;;  %v4026_v7 = vld [vmem:[#allocation18_spill] sm:$0xff] }
  0xb9   :  { %1697 = vmatprep.subr.bf16.mxu1 %v4015_v20  ;;  %1671 = vmatpush3.bf16.msra.mxu0 %v4018_v34  ;;  %vm156_vm2 = vcmp.eq.s32.totalorder %v4004_v52, %v2621_v19  ;;  %vm191_vm3 = vcmp.eq.s32.totalorder %v4004_v52, %v2652_v44  ;;  %v328_v51 = vadd.s32 %v102_v32, %v67_v5  ;;  %v137_v55 = vsel %vm121_vm0, 1, %v3984_v62  ;;  %v4032_v5 = vld [vmem:[#allocation23_spill] sm:$0xff] }
  0xba   :  { %1673 = vmatprep.subr.bf16.mxu0 %v4021_v50  ;;  %vm88_vm4 = vcmp.eq.s32.totalorder %v4022_v37, %v2623_v4  ;;  %v373_v15 = vadd.s32 %v357_v45, %v204_v16  ;;  %vm226_vm5 = vcmp.eq.s32.totalorder %v4004_v52, %v2654_v40  ;;  %vm53_vm6 = vcmp.eq.s32.totalorder %v4022_v37, %v2550_v35  ;;  %v4027_v16 = vld [vmem:[#allocation17_spill] sm:$0xff] }
  0xbb   :  { %v4025_v60 = vpack.c.bf16 %v4023_v28, %v4024_v29  ;;  %v274_v18 = vsel %vm258_vm1, 1, %v3984_v62  ;;  %vm293_vm7 = vcmp.eq.s32.totalorder %v2295_v25, %v2713_v46  ;;  %v344_v32 = vadd.s32 %v328_v51, %v137_v55  ;;  %v4036_v55 = vld [vmem:[#allocation32_spill] sm:$0xff] }
  0xbc   :  { %v104_v45 = vsel %vm88_vm4, 1, %v3984_v62  ;;  %v4028_v42 = vpack.c.bf16 %v4026_v7, %v4027_v16  ;;  %v4029_v0 = vpack.c.bf16 %v2412_v27, %v2407_v48  ;;  %v419_v20 = vadd.s32 %v403_v24, %v307_v2 }
  0xbd   :  { %1699 = vmatpush3.bf16.msra.mxu1 %v4025_v60  ;;  %v172_v9 = vsel %vm156_vm2, 1, %v3984_v62  ;;  %v207_v14 = vsel %vm191_vm3, 1, %v3984_v62  ;;  %vm123_vm8 = vcmp.eq.s32.totalorder %v4022_v37, %v2548_v43  ;;  %v4030_v34 = vpack.c.bf16 %v2432_v47, %v2427_v1  ;;  %v4031_v47 = vld [vmem:[#allocation24_spill] sm:$0xff] }
  0xbe   :  { %1701 = vmatprep.subr.bf16.mxu1 %v4028_v42  ;;  %1675 = vmatpush3.bf16.msra.mxu0 %v4029_v0  ;;  %v242_v48 = vsel %vm226_vm5, 1, %v3984_v62  ;;  %vm261_vm10 = vcmp.eq.s32.totalorder %v4004_v52, %v2682_v31  ;;  %v360_v27 = vadd.s32 %v344_v32, %v172_v9  ;;  %v69_v2 = vsel %vm53_vm6, 1, %v3984_v62  ;;  %v3109_v32 = vld [vmem:[%s3878_s1 + $0x430] sm:$0xff]  ;;  %v4039_v0 = vld [vmem:[#allocation27_spill] sm:$0xff]  ;;  %v3143_v9 = vld [vmem:[%s3878_s1 + $0x538] sm:$0xff] }
  0xbf   :  { %1677 = vmatprep.subr.bf16.mxu0 %v4030_v34  ;;  %v389_v24 = vadd.s32 %v373_v15, %v239_v23  ;;  %vm158_vm9 = vcmp.eq.s32.totalorder %v4022_v37, %v2621_v19  ;;  %vm193_vm11 = vcmp.eq.s32.totalorder %v4022_v37, %v2652_v44  ;;  %v330_v1 = vadd.s32 %v104_v45, %v69_v2  ;;  %v4035_v15 = vld [vmem:[#allocation33_spill] sm:$0xff]  ;;  %v4041_v34 = vld [vmem:[#allocation28_spill] sm:$0xff] }
  0xc0   :  { %v4033_v6 = vpack.c.bf16 %v4031_v47, %v4032_v5  ;;  %v309_v12 = vsel %vm293_vm7, 1, %v3984_v62  ;;  %vm296_vm12 = vcmp.eq.s32.totalorder %v4004_v52, %v2713_v46  ;;  %v376_v23 = vadd.s32 %v360_v27, %v207_v14  ;;  %v3130_v42 = vld [vmem:[%s3878_s1 + $0x530] sm:$0xff]  ;;  %v3148_v14 = vld [vmem:[%s3878_s1 + $0x4c0] sm:$0xff]  ;;  %v3172_v47 = vld [vmem:[%s3878_s1 + $0x5c8] sm:$0xff] }
  0xc1   :  { %v139_v50 = vsel %vm123_vm8, 1, %v3984_v62  ;;  %v4034_v51 = vpack.c.bf16 %v2402_v26, %v2397_v38  ;;  %v4037_v28 = vpack.c.bf16 %v4035_v15, %v4036_v55  ;;  %v435_v29 = vcvt.s32.f32 %v419_v20  ;;  %v3114_v26 = vld [vmem:[%s3878_s1 + $0x438] sm:$0xff]  ;;  %v4040_v52 = vld [vmem:[#allocation29_spill] sm:$0xff]  ;;  %v4043_v5 = vld [vmem:[#allocation31_spill] sm:$0xff] }
  0xc2   :  { %1703 = vmatpush3.bf16.msra.mxu1 %v4033_v6  ;;  %v277_v60 = vsel %vm261_vm10, 1, %v3984_v62  ;;  %vm228_vm13 = vcmp.eq.s32.totalorder %v4022_v37, %v2654_v40  ;;  %v346_v25 = vadd.s32 %v330_v1, %v139_v50  ;;  %v4038_v38 = vpack.c.bf16 %v2486_v36, %v2481_v11  ;;  %v3167_v1 = vld [vmem:[%s3878_s1 + $0x5c0] sm:$0xff]  ;;  %v4044_v6 = vld [vmem:[#allocation30_spill] sm:$0xff] }
  0xc3   :  { %1705 = vmatprep.subr.bf16.mxu1 %v4034_v51  ;;  %1679 = vmatpush3.bf16.msra.mxu0 %v4037_v28  ;;  %v392_v45 = vadd.s32 %v376_v23, %v242_v48  ;;  %v174_v7 = vsel %vm158_vm9, 1, %v3984_v62  ;;  %v209_v16 = vsel %vm193_vm11, 1, %v3984_v62  ;;  %vm85_vm14 = vcmp.eq.s32.totalorder %v4039_v0, %v2623_v4  ;;  %v4046_v51 = vld [vmem:[#allocation40_spill] sm:$0xff]  ;;  %v4047_v15 = vld [vmem:[#allocation39_spill] sm:$0xff] }
  0xc4   :  { %1713 = vmatprep.subr.bf16.mxu0 %v4038_v38  ;;  %v405_v11 = vadd.s32 %v389_v24, %v274_v18  ;;  %v312_v36 = vsel %vm296_vm12, 1, %v3984_v62  ;;  %vm263_vm15 = vcmp.eq.s32.totalorder %v4022_v37, %v2682_v31  ;;  %v362_v20 = vadd.s32 %v346_v25, %v174_v7  ;;  %v3153_v18 = vld [vmem:[%s3878_s1 + $0x4c8] sm:$0xff]  ;;  %v4050_v7 = vld [vmem:[#allocation43_spill] sm:$0xff] }
  0xc5   :  { %v4042_v48 = vpack.c.bf16 %v4040_v52, %v4041_v34  ;;  %v408_v27 = vadd.s32 %v392_v45, %v277_v60  ;;  %v244_v2 = vsel %vm228_vm13, 1, %v3984_v62  ;;  %vm50_vm0 = vcmp.eq.s32.totalorder %v4039_v0, %v2550_v35  ;;  %v3192_v60 = vld [vmem:[%s3878_s1 + $0x448] sm:$0xff]  ;;  %v3212_v52 = vld [vmem:[%s3878_s1 + $0x540] sm:$0xff]  ;;  %v3222_v34 = vld [vmem:[%s3878_s1 + $0x4d0] sm:$0xff] }
  0xc6   :  { %908 = vmatmul.mubr.f32.vlgmr.msra.gmra.mrb[2].mxu0 %v435_v29  ;;  %v4045_v23 = vpack.c.bf16 %v4043_v5, %v4044_v6  ;;  %v421_v50 = vadd.s32 %v405_v11, %v309_v12  ;;  %v4048_v55 = vpack.c.bf16 %v4046_v51, %v4047_v15  ;;  %vm298_vm1 = vcmp.eq.s32.totalorder %v4022_v37, %v2713_v46  ;;  %v3187_v29 = vld [vmem:[%s3878_s1 + $0x440] sm:$0xff]  ;;  %v4049_v45 = vld [vmem:[#allocation44_spill] sm:$0xff]  ;;  %v3229_v5 = vld [vmem:[%s3878_s1 + $0x4d8] sm:$0xff] }
  0xc7   :  { %1707 = vmatpush3.bf16.msra.mxu1 %v4042_v48  ;;  %v378_v28 = vadd.s32 %v362_v20, %v209_v16  ;;  %v101_v12 = vsel %vm85_vm14, 1, %v3984_v62  ;;  %v424_v25 = vadd.s32 %v408_v27, %v312_v36  ;;  %v279_v38 = vsel %vm263_vm15, 1, %v3984_v62  ;;  %v3217_v36 = vld [vmem:[%s3878_s1 + $0x548] sm:$0xff]  ;;  %v3234_v6 = vld [vmem:[%s3878_s1 + $0x5d0] sm:$0xff]  ;;  %v4053_v15 = vld [vmem:[#allocation35_spill] sm:$0xff] }
  0xc8   :  { %1709 = vmatprep.subr.bf16.mxu1 %v4045_v23  ;;  %1715 = vmatpush3.bf16.msra.mxu0 %v4048_v55  ;;  %v4051_v16 = vpack.c.bf16 %v4049_v45, %v4050_v7  ;;  %v3239_v23 = vld [vmem:[%s3878_s1 + $0x5d8] sm:$0xff]  ;;  %v4052_v51 = vld [vmem:[#allocation36_spill] sm:$0xff]  ;;  %v314_v7 = vsel %vm298_vm1, 1, %v3984_v62  ;;  %vm120_vm3 = vcmp.eq.s32.totalorder %v4039_v0, %v2548_v43  ;;  %v4061_v20 = vpack.c.bf16 %v4059_v39, %v4060_v33  ;;  %v3288_v39 = vld [vmem:[%s3878_s1 + $0x550] sm:$0xff] }
  0xc9   :  { %v394_v48 = vadd.s32 %v378_v28, %v244_v2  ;;  %v66_v2 = vsel %vm50_vm0, 1, %v3984_v62  ;;  %vm87_vm2 = vcmp.eq.s32.totalorder %v4052_v51, %v2623_v4  ;;  %v4054_v55 = vld [vmem:[#allocation34_spill] sm:$0xff]  ;;  %v440_v45 = vcvt.s32.f32 %v424_v25 }
  0xca   :  { %1717 = vmatprep.subr.bf16.mxu0 %v4051_v16  ;;  %v4055_v28 = vpack.c.bf16 %v4053_v15, %v4054_v55  ;;  %v3257_v16 = vld [vmem:[%s3878_s1 + $0x450] sm:$0xff]  ;;  %v3262_v27 = vld [vmem:[%s3878_s1 + $0x458] sm:$0xff]  ;;  %v327_v15 = vadd.s32 %v101_v12, %v66_v2  ;;  %v437_v25 = vcvt.s32.f32 %v421_v50  ;;  %v1730_v24 = vpack.c.bf16 %v3192_v60, %v3187_v29  ;;  %v3319_v2 = vld [vmem:[%s3878_s1 + $0x468] sm:$0xff] }
  0xcb   :  { %v4056_v55 = vld [vmem:[#allocation38_spill] sm:$0xff]  ;;  %v410_v37 = vadd.s32 %v394_v48, %v279_v38  ;;  %vm52_vm4 = vcmp.eq.s32.totalorder %v4052_v51, %v2550_v35  ;;  %1047 = vmatprep.mubr.f32.mxu0 %v440_v45  ;;  %v103_v57 = vsel %vm87_vm2, 1, %v3984_v62  ;;  %v3314_v48 = vld [vmem:[%s3878_s1 + $0x460] sm:$0xff]  ;;  %v136_v45 = vsel %vm120_vm3, 1, %v3984_v62 }
  0xcc   :  { %1711 = vmatpush3.bf16.msra.mxu1 %v4055_v28  ;;  %v4057_v28 = vld [vmem:[#allocation37_spill] sm:$0xff]  ;;  %1719 = vmatpush3.bf16.msra.mxu0 %v4061_v20  ;;  %v3293_v38 = vld [vmem:[%s3878_s1 + $0x558] sm:$0xff]  ;;  %v3309_v20 = vld [vmem:[%s3878_s1 + $0x4e8] sm:$0xff]  ;;  %vm155_vm5 = vcmp.eq.s32.totalorder %v4039_v0, %v2621_v19  ;;  %vm190_vm6 = vcmp.eq.s32.totalorder %v4039_v0, %v2652_v44  ;;  %v343_v33 = vadd.s32 %v327_v15, %v136_v45 }
  0xcd   :  { %v4058_v11 = vpack.c.bf16 %v4056_v55, %v4057_v28  ;;  %1721 = vmatprep.subr.bf16.mxu0 %v1720_v17  ;;  %v426_v17 = vadd.s32 %v410_v37, %v314_v7  ;;  %v4062_v7 = vld [vmem:[#allocation42_spill] sm:$0xff]  ;;  %v3333_v28 = vld [vmem:[%s3878_s1 + $0x4f0] sm:$0xff]  ;;  %v4066_v50 = vld [vmem:[#allocation47_spill] sm:$0xff]  ;;  %vm225_vm8 = vcmp.eq.s32.totalorder %v4039_v0, %v2654_v40  ;;  %vm122_vm10 = vcmp.eq.s32.totalorder %v4052_v51, %v2548_v43 }
  0xce   :  { %v3338_v37 = vld [vmem:[%s3878_s1 + $0x4f8] sm:$0xff]  ;;  %v1738_v61 = vpack.c.bf16 %v3319_v2, %v3314_v48  ;;  %v206_v8 = vsel %vm190_vm6, 1, %v3984_v62  ;;  %vm260_vm12 = vcmp.eq.s32.totalorder %v4039_v0, %v2682_v31  ;;  %vm157_vm13 = vcmp.eq.s32.totalorder %v4052_v51, %v2621_v19 }
  0xcf   :  { %1745 = vmatprep.subr.bf16.mxu1 %v4058_v11  ;;  %978 = vmatmul.mubr.f32.vlgmr.msra.gmra.mrb[2].mxu1 %v437_v25  ;;  %v4063_v25 = vld [vmem:[#allocation41_spill] sm:$0xff]  ;;  %v4067_v11 = vld [vmem:[#allocation46_spill] sm:$0xff]  ;;  %v1740_v58 = vpack.c.bf16 %v3338_v37, %v3333_v28  ;;  %v4073_v13 = vpack.c.bf16 %v3153_v18, %v3148_v14  ;;  %vm92_vm0 = vcmp.eq.s32.totalorder %v2915_v59, %v2623_v4 }
  0xd0   :  { %v4064_v55 = vpack.c.bf16 %v4062_v7, %v4063_v25  ;;  %v68_v7 = vsel %vm52_vm4, 1, %v3984_v62  ;;  %v4065_v25 = vld [vmem:[#allocation45_spill] sm:$0xff]  ;;  %v4068_v12 = vpack.c.bf16 %v4066_v50, %v4067_v11  ;;  %1723 = vmatpush3.bf16.msra.mxu0 %v1722_v53  ;;  %v1736_v50 = vpack.c.bf16 %v3309_v20, %v3298_v56  ;;  %v638_v48 = vld [vmem:[%s3878_s1 + $0x5f8] sm:$0xff] }
  0xd1   :  { %vm90_vm7 = vcmp.eq.s32.totalorder %v4065_v25, %v2623_v4  ;;  %v329_v15 = vadd.s32 %v103_v57, %v68_v7  ;;  %1725 = vmatprep.subr.bf16.mxu0 %v1724_v10  ;;  %vm55_vm9 = vcmp.eq.s32.totalorder %v4065_v25, %v2550_v35  ;;  %v171_v53 = vsel %vm155_vm5, 1, %v3984_v62  ;;  %v4069_v10 = vld [vmem:[#allocation51_spill] sm:$0xff] }
  0xd2   :  { %1747 = vmatpush3.bf16.msra.mxu1 %v4064_v55  ;;  %v442_v55 = vcvt.s32.f32 %v426_v17  ;;  %v1766_v17 = vpack.c.bf16 %v3293_v38, %v3288_v39  ;;  %v106_v41 = vsel %vm90_vm7, 1, %v3984_v62  ;;  %v241_v11 = vsel %vm225_vm8, 1, %v3984_v62  ;;  %v622_v39 = vld [vmem:[%s3878_s1 + $0x578] sm:$0xff]  ;;  %v687_v38 = vld [vmem:[%s3878_s1 + $0x780] sm:$0xff] }
  0xd3   :  { %1749 = vmatprep.subr.bf16.mxu1 %v4068_v12  ;;  %v4070_v12 = vld [vmem:[#allocation50_spill] sm:$0xff]  ;;  %v359_v45 = vadd.s32 %v343_v33, %v171_v53  ;;  %v138_v7 = vsel %vm122_vm10, 1, %v3984_v62  ;;  %vm125_vm11 = vcmp.eq.s32.totalorder %v4065_v25, %v2548_v43  ;;  %v71_v53 = vsel %vm55_vm9, 1, %v3984_v62 }
  0xd4   :  { %1117 = vmatprep.mubr.f32.mxu1 %v442_v55  ;;  %v4071_v57 = vpack.c.bf16 %v4069_v10, %v4070_v12  ;;  %v4072_v55 = vpack.c.bf16 %v3114_v26, %v3109_v32  ;;  %v345_v33 = vadd.s32 %v329_v15, %v138_v7  ;;  %vm160_vm14 = vcmp.eq.s32.totalorder %v4065_v25, %v2621_v19 }
  0xd5   :  { %vm195_vm15 = vcmp.eq.s32.totalorder %v4065_v25, %v2652_v44  ;;  %v332_v30 = vadd.s32 %v106_v41, %v71_v53  ;;  %vm295_vm1 = vcmp.eq.s32.totalorder %v4039_v0, %v2713_v46  ;;  %vm192_vm2 = vcmp.eq.s32.totalorder %v4052_v51, %v2652_v44  ;;  %v656_v53 = vld [vmem:[%s3878_s1 + $0x688] sm:$0xff] }
  0xd6   :  { %1751 = vmatpush3.bf16.msra.mxu1 %v4071_v57  ;;  %1727 = vmatpush3.bf16.msra.mxu0 %v4072_v55  ;;  %vm57_vm3 = vcmp.eq.s32.totalorder %v2915_v59, %v2550_v35  ;;  %v4074_v32 = vpack.c.bf16 %v2955_v3, %v2937_v21  ;;  %v375_v26 = vadd.s32 %v359_v45, %v206_v8  ;;  %v108_v18 = vsel %vm92_vm0, 1, %v3984_v62 }
  0xd7   :  { %1753 = vmatprep.subr.bf16.mxu1 %v1752_v63  ;;  %1729 = vmatprep.subr.bf16.mxu0 %v4073_v13  ;;  %v141_v63 = vsel %vm125_vm11, 1, %v3984_v62  ;;  %vm230_vm4 = vcmp.eq.s32.totalorder %v4065_v25, %v2654_v40  ;;  %v4075_v15 = vpack.c.bf16 %v2983_v54, %v2978_v22  ;;  %v173_v21 = vsel %vm157_vm13, 1, %v3984_v62 }
  0xd8   :  { %v348_v14 = vadd.s32 %v332_v30, %v141_v63  ;;  %v176_v3 = vsel %vm160_vm14, 1, %v3984_v62  ;;  %v211_v22 = vsel %vm195_vm15, 1, %v3984_v62  ;;  %vm127_vm5 = vcmp.eq.s32.totalorder %v2915_v59, %v2548_v43 }
  0xd9   :  { %v4076_v54 = vpack.c.bf16 %v3229_v5, %v3222_v34  ;;  %v361_v29 = vadd.s32 %v345_v33, %v173_v21  ;;  %v73_v8 = vsel %vm57_vm3, 1, %v3984_v62  ;;  %v246_v41 = vsel %vm230_vm4, 1, %v3984_v62  ;;  %v635_v5 = vld [vmem:[%s3878_s1 + $0x5e0] sm:$0xff] }
  0xda   :  { %1755 = vmatpush3.bf16.msra.mxu1 %v4074_v32  ;;  %1731 = vmatpush3.bf16.msra.mxu0 %v1730_v24  ;;  %v208_v24 = vsel %vm192_vm2, 1, %v3984_v62  ;;  %v364_v60 = vadd.s32 %v348_v14, %v176_v3  ;;  %vm162_vm6 = vcmp.eq.s32.totalorder %v2915_v59, %v2621_v19  ;;  %vm197_vm7 = vcmp.eq.s32.totalorder %v2915_v59, %v2652_v44  ;;  %v619_v32 = vld [vmem:[%s3878_s1 + $0x560] sm:$0xff]  ;;  %v640_v3 = vld [vmem:[%s3878_s1 + $0x608] sm:$0xff] }
  0xdb   :  { %1757 = vmatprep.subr.bf16.mxu1 %v4075_v15  ;;  %1733 = vmatprep.subr.bf16.mxu0 %v4076_v54  ;;  %v334_v10 = vadd.s32 %v108_v18, %v73_v8  ;;  %v4077_v34 = vpack.c.bf16 %v3143_v9, %v3130_v42  ;;  %v391_v12 = vadd.s32 %v375_v26, %v241_v11  ;;  %v143_v45 = vsel %vm127_vm5, 1, %v3984_v62  ;;  %v636_v42 = vld [vmem:[%s3878_s1 + $0x5e8] sm:$0xff]  ;;  %v589_v9 = vld [vmem:[%s3878_s1 + $0x470] sm:$0xff]  ;;  %v590_v11 = vld [vmem:[%s3878_s1 + $0x478] sm:$0xff] }
  0xdc   :  { %vm265_vm8 = vcmp.eq.s32.totalorder %v4065_v25, %v2682_v31  ;;  %v380_v57 = vadd.s32 %v364_v60, %v211_v22  ;;  %v4078_v7 = vpack.c.bf16 %v3172_v47, %v3167_v1  ;;  %v4079_v55 = vpack.c.bf16 %v3262_v27, %v3257_v16  ;;  %v620_v26 = vld [vmem:[%s3878_s1 + $0x568] sm:$0xff]  ;;  %v658_v54 = vld [vmem:[%s3878_s1 + $0x698] sm:$0xff] }
  0xdd   :  { %v276_v1 = vsel %vm260_vm12, 1, %v3984_v62  ;;  %vm227_vm10 = vcmp.eq.s32.totalorder %v4052_v51, %v2654_v40  ;;  %vm300_vm9 = vcmp.eq.s32.totalorder %v4065_v25, %v2713_v46  ;;  %v350_v47 = vadd.s32 %v334_v10, %v143_v45  ;;  %v639_v25 = vld [vmem:[%s3878_s1 + $0x600] sm:$0xff]  ;;  %v621_v10 = vld [vmem:[%s3878_s1 + $0x570] sm:$0xff] }
  0xde   :  { %1759 = vmatpush3.bf16.msra.mxu1 %v4077_v34  ;;  %1735 = vmatpush3.bf16.msra.mxu0 %v4079_v55  ;;  %v396_v27 = vadd.s32 %v380_v57, %v246_v41  ;;  %v178_v16 = vsel %vm162_vm6, 1, %v3984_v62  ;;  %v213_v33 = vsel %vm197_vm7, 1, %v3984_v62  ;;  %vm232_vm11 = vcmp.eq.s32.totalorder %v2915_v59, %v2654_v40  ;;  %v688_v57 = vld [vmem:[%s3878_s1 + $0x788] sm:$0xff]  ;;  %v642_v55 = vld [vmem:[%s3878_s1 + $0x618] sm:$0xff] }
  0xdf   :  { %1761 = vmatprep.subr.bf16.mxu1 %v4078_v7  ;;  %1737 = vmatprep.subr.bf16.mxu0 %v1736_v50  ;;  %v311_v56 = vsel %vm295_vm1, 1, %v3984_v62  ;;  %v377_v20 = vadd.s32 %v361_v29, %v208_v24  ;;  %v655_v50 = vld [vmem:[%s3878_s1 + $0x680] sm:$0xff]  ;;  %v281_v13 = vsel %vm265_vm8, 1, %v3984_v62  ;;  %v366_v30 = vadd.s32 %v350_v47, %v178_v16  ;;  %v641_v7 = vld [vmem:[%s3878_s1 + $0x610] sm:$0xff] }
  0xe0   :  { %v4080_v63 = vpack.c.bf16 %v3217_v36, %v3212_v52  ;;  %v1768_v0 = vpack.c.bf16 %v636_v42, %v635_v5  ;;  %v1742_v14 = vpack.c.bf16 %v590_v11, %v589_v9  ;;  %v407_v18 = vadd.s32 %v391_v12, %v276_v1  ;;  %v637_v36 = vld [vmem:[%s3878_s1 + $0x5f0] sm:$0xff]  ;;  %v659_v9 = vld [vmem:[%s3878_s1 + $0x6a0] sm:$0xff]  ;;  %v660_v11 = vld [vmem:[%s3878_s1 + $0x6a8] sm:$0xff] }
  0xe1   :  { %v243_v15 = vsel %vm227_vm10, 1, %v3984_v62  ;;  %v4081_v52 = vpack.c.bf16 %v3239_v23, %v3234_v6  ;;  %vm262_vm12 = vcmp.eq.s32.totalorder %v4052_v51, %v2682_v31  ;;  %v316_v21 = vsel %vm300_vm9, 1, %v3984_v62 }
  0xe2   :  { %1763 = vmatpush3.bf16.msra.mxu1 %v4080_v63  ;;  %1739 = vmatpush3.bf16.msra.mxu0 %v1738_v61  ;;  %v248_v6 = vsel %vm232_vm11, 1, %v3984_v62  ;;  %v382_v23 = vadd.s32 %v366_v30, %v213_v33  ;;  %v423_v2 = vadd.s32 %v407_v18, %v311_v56  ;;  %v1776_v61 = vpack.c.bf16 %v656_v53, %v655_v50  ;;  %v671_v33 = vld [vmem:[%s3878_s1 + $0x700] sm:$0xff]  ;;  %v672_v56 = vld [vmem:[%s3878_s1 + $0x708] sm:$0xff]  ;;  %v690_v30 = vld [vmem:[%s3878_s1 + $0x798] sm:$0xff] }
  0xe3   :  { %1765 = vmatprep.subr.bf16.mxu1 %v4081_v52  ;;  %1741 = vmatprep.subr.bf16.mxu0 %v1740_v58  ;;  %v412_v22 = vadd.s32 %v396_v27, %v281_v13  ;;  %vm267_vm13 = vcmp.eq.s32.totalorder %v2915_v59, %v2682_v31  ;;  %v1770_v28 = vpack.c.bf16 %v620_v26, %v619_v32  ;;  %v657_v58 = vld [vmem:[%s3878_s1 + $0x690] sm:$0xff]  ;;  %v3573_v24 = vadd.s32 1536, %v2114_v49  ;;  %v644_v32 = vld [vmem:[%s3878_s1 + $0x628] sm:$0xff] }
  0xe4   :  { %vm297_vm14 = vcmp.eq.s32.totalorder %v4052_v51, %v2713_v46  ;;  %v393_v37 = vadd.s32 %v377_v20, %v243_v15  ;;  %v278_v29 = vsel %vm262_vm12, 1, %v3984_v62  ;;  %vm302_vm15 = vcmp.eq.s32.totalorder %v2915_v59, %v2713_v46  ;;  %v689_v20 = vld [vmem:[%s3878_s1 + $0x790] sm:$0xff] }
  0xe5   :  { %v428_v60 = vadd.s32 %v412_v22, %v316_v21  ;;  %v398_v8 = vadd.s32 %v382_v23, %v248_v6  ;;  %v1772_v41 = vpack.c.bf16 %v638_v48, %v637_v36  ;;  %v283_v34 = vsel %vm267_vm13, 1, %v3984_v62  ;;  %v661_v26 = vld [vmem:[%s3878_s1 + $0x6b0] sm:$0xff]  ;;  %v674_v48 = vld [vmem:[%s3878_s1 + $0x718] sm:$0xff] }
  0xe6   :  { %1767 = vmatpush3.bf16.msra.mxu1 %v1766_v17  ;;  %1743 = vmatpush3.bf16.msra.mxu0 %v1742_v14  ;;  %v1778_v17 = vpack.c.bf16 %v640_v3, %v639_v25  ;;  %v439_v5 = vcvt.s32.f32 %v423_v2  ;;  %v313_v12 = vsel %vm297_vm14, 1, %v3984_v62  ;;  %v1780_v45 = vpack.c.bf16 %v658_v54, %v657_v58  ;;  %v662_v14 = vld [vmem:[%s3878_s1 + $0x6b8] sm:$0xff]  ;;  %v673_v23 = vld [vmem:[%s3878_s1 + $0x710] sm:$0xff]  ;;  %v691_v2 = vld [vmem:[%s3878_s1 + $0x7a0] sm:$0xff] }
  0xe7   :  { %1769 = vmatprep.subr.bf16.mxu1 %v1768_v0  ;;  %1777 = vmatprep.subr.bf16.mxu0 %v1776_v61  ;;  %vm89_vm0 = vcmp.eq.s32.totalorder %v3573_v24, %v2623_v4  ;;  %v409_v42 = vadd.s32 %v393_v37, %v278_v29  ;;  %v318_v51 = vsel %vm302_vm15, 1, %v3984_v62  ;;  %v1774_v1 = vpack.c.bf16 %v622_v39, %v621_v10  ;;  %v643_v0 = vld [vmem:[%s3878_s1 + $0x620] sm:$0xff]  ;;  %v692_v3 = vld [vmem:[%s3878_s1 + $0x7a8] sm:$0xff]  ;;  %v646_v37 = vld [vmem:[%s3878_s1 + $0x638] sm:$0xff] }
  0xe8   :  { %v444_v47 = vcvt.s32.f32 %v428_v60  ;;  %v414_v27 = vadd.s32 %v398_v8, %v283_v34  ;;  %vm54_vm1 = vcmp.eq.s32.totalorder %v3573_v24, %v2550_v35  ;;  %v1808_v59 = vpack.c.bf16 %v688_v57, %v687_v38  ;;  %v663_v58 = vld [vmem:[%s3878_s1 + $0x6c0] sm:$0xff]  ;;  %v664_v54 = vld [vmem:[%s3878_s1 + $0x6c8] sm:$0xff] }
  0xe9   :  { %1048 = vmatmul.mubr.f32.vlgmr.msra.gmra.mrb[4].mxu0 %v439_v5  ;;  %v425_v16 = vadd.s32 %v409_v42, %v313_v12  ;;  %v1782_v50 = vpack.c.bf16 %v642_v55, %v641_v7  ;;  %v105_v53 = vsel %vm89_vm0, 1, %v3984_v62  ;;  %v1784_v63 = vpack.c.bf16 %v660_v11, %v659_v9  ;;  %v675_v39 = vld [vmem:[%s3878_s1 + $0x720] sm:$0xff]  ;;  %v676_v38 = vld [vmem:[%s3878_s1 + $0x728] sm:$0xff]  ;;  %v665_v7 = vld [vmem:[%s3878_s1 + $0x6d0] sm:$0xff] }
  0xea   :  { %1771 = vmatpush3.bf16.msra.mxu1 %v1770_v28  ;;  %1779 = vmatpush3.bf16.msra.mxu0 %v1778_v17  ;;  %v430_v13 = vadd.s32 %v414_v27, %v318_v51  ;;  %v70_v18 = vsel %vm54_vm1, 1, %v3984_v62  ;;  %v3657_v15 = vadd.s32 1792, %v2114_v49  ;;  %v1810_v52 = vpack.c.bf16 %v672_v56, %v671_v33  ;;  %v645_v28 = vld [vmem:[%s3878_s1 + $0x630] sm:$0xff]  ;;  %v647_v12 = vld [vmem:[%s3878_s1 + $0x640] sm:$0xff]  ;;  %v648_v57 = vld [vmem:[%s3878_s1 + $0x648] sm:$0xff] }
  0xeb   :  { %1773 = vmatprep.subr.bf16.mxu1 %v1772_v41  ;;  %1187 = vmatprep.mubr.f32.mxu0 %v444_v47  ;;  %vm124_vm2 = vcmp.eq.s32.totalorder %v3573_v24, %v2548_v43  ;;  %v331_v36 = vadd.s32 %v105_v53, %v70_v18  ;;  %v441_v21 = vcvt.s32.f32 %v425_v16  ;;  %v1812_v6 = vpack.c.bf16 %v690_v30, %v689_v20  ;;  %v693_v17 = vld [vmem:[%s3878_s1 + $0x7b0] sm:$0xff]  ;;  %v666_v55 = vld [vmem:[%s3878_s1 + $0x6d8] sm:$0xff]  ;;  %v695_v27 = vld [vmem:[%s3878_s1 + $0x7c0] sm:$0xff] }
  0xec   :  { %1781 = vmatprep.subr.bf16.mxu0 %v1780_v45  ;;  %v1786_v61 = vpack.c.bf16 %v644_v32, %v643_v0  ;;  %vm91_vm3 = vcmp.eq.s32.totalorder %v3657_v15, %v2623_v4  ;;  %v446_v25 = vcvt.s32.f32 %v430_v13  ;;  %v1788_v22 = vpack.c.bf16 %v662_v14, %v661_v26  ;;  %v694_v4 = vld [vmem:[%s3878_s1 + $0x7b8] sm:$0xff]  ;;  %v696_v33 = vld [vmem:[%s3878_s1 + $0x7c8] sm:$0xff]  ;;  %v649_v20 = vld [vmem:[%s3878_s1 + $0x650] sm:$0xff] }
  0xed   :  { %v140_v29 = vsel %vm124_vm2, 1, %v3984_v62  ;;  %vm56_vm4 = vcmp.eq.s32.totalorder %v3657_v15, %v2550_v35  ;;  %v1814_v60 = vpack.c.bf16 %v674_v48, %v673_v23  ;;  %vm159_vm5 = vcmp.eq.s32.totalorder %v3573_v24, %v2621_v19  ;;  %v678_v47 = vld [vmem:[%s3878_s1 + $0x738] sm:$0xff]  ;;  %v667_v13 = vld [vmem:[%s3878_s1 + $0x6e0] sm:$0xff]  ;;  %v668_v30 = vld [vmem:[%s3878_s1 + $0x6e8] sm:$0xff] }
  0xee   :  { %1775 = vmatpush3.bf16.msra.mxu1 %v1774_v1  ;;  %1783 = vmatpush3.bf16.msra.mxu0 %v1782_v50  ;;  %v347_v8 = vadd.s32 %v331_v36, %v140_v29  ;;  %v107_v41 = vsel %vm91_vm3, 1, %v3984_v62  ;;  %v1816_v10 = vpack.c.bf16 %v692_v3, %v691_v2  ;;  %v1790_v34 = vpack.c.bf16 %v646_v37, %v645_v28  ;;  %v677_v1 = vld [vmem:[%s3878_s1 + $0x730] sm:$0xff]  ;;  %v650_v50 = vld [vmem:[%s3878_s1 + $0x658] sm:$0xff]  ;;  %v680_v14 = vld [vmem:[%s3878_s1 + $0x748] sm:$0xff] }
  0xef   :  { %1809 = vmatprep.subr.bf16.mxu1 %v1808_v59  ;;  %1785 = vmatprep.subr.bf16.mxu0 %v1784_v63  ;;  %v1792_v5 = vpack.c.bf16 %v664_v54, %v663_v58  ;;  %vm194_vm6 = vcmp.eq.s32.totalorder %v3573_v24, %v2652_v44  ;;  %v72_v45 = vsel %vm56_vm4, 1, %v3984_v62  ;;  %v175_v42 = vsel %vm159_vm5, 1, %v3984_v62  ;;  %v697_v18 = vld [vmem:[%s3878_s1 + $0x7d0] sm:$0xff]  ;;  %v651_v23 = vld [vmem:[%s3878_s1 + $0x660] sm:$0xff]  ;;  %v652_v48 = vld [vmem:[%s3878_s1 + $0x668] sm:$0xff] }
  0xf0   :  { %vm126_vm7 = vcmp.eq.s32.totalorder %v3657_v15, %v2548_v43  ;;  %v333_v51 = vadd.s32 %v107_v41, %v72_v45  ;;  %v1818_v35 = vpack.c.bf16 %v676_v38, %v675_v39  ;;  %v363_v9 = vadd.s32 %v347_v8, %v175_v42  ;;  %v679_v43 = vld [vmem:[%s3878_s1 + $0x740] sm:$0xff]  ;;  %v669_v2 = vld [vmem:[%s3878_s1 + $0x6f0] sm:$0xff]  ;;  %v682_v58 = vld [vmem:[%s3878_s1 + $0x758] sm:$0xff] }
  0xf1   :  { %1118 = vmatmul.mubr.f32.vlgmr.msra.gmra.mrb[4].mxu1 %v441_v21  ;;  %v1820_v11 = vpack.c.bf16 %v694_v4, %v693_v17  ;;  %v1794_v16 = vpack.c.bf16 %v648_v57, %v647_v12  ;;  %v210_v59 = vsel %vm194_vm6, 1, %v3984_v62  ;;  %v1796_v56 = vpack.c.bf16 %v666_v55, %v665_v7  ;;  %v698_v21 = vld [vmem:[%s3878_s1 + $0x7d8] sm:$0xff]  ;;  %v681_v37 = vld [vmem:[%s3878_s1 + $0x750] sm:$0xff]  ;;  %v699_v54 = vld [vmem:[%s3878_s1 + $0x7e0] sm:$0xff] }
  0xf2   :  { %1811 = vmatpush3.bf16.msra.mxu1 %v1810_v52  ;;  %1257 = vmatprep.mubr.f32.mxu1 %v446_v25  ;;  %vm229_vm8 = vcmp.eq.s32.totalorder %v3573_v24, %v2654_v40  ;;  %v142_v53 = vsel %vm126_vm7, 1, %v3984_v62  ;;  %vm161_vm10 = vcmp.eq.s32.totalorder %v3657_v15, %v2621_v19  ;;  %v1822_v0 = vpack.c.bf16 %v678_v47, %v677_v1  ;;  %v700_v8 = vld [vmem:[%s3878_s1 + $0x7e8] sm:$0xff]  ;;  %v654_v39 = vld [vmem:[%s3878_s1 + $0x678] sm:$0xff]  ;;  %v683_v12 = vld [vmem:[%s3878_s1 + $0x760] sm:$0xff] }
  0xf3   :  { %1813 = vmatprep.subr.bf16.mxu1 %v1812_v6  ;;  %1787 = vmatpush3.bf16.msra.mxu0 %v1786_v61  ;;  %v349_v63 = vadd.s32 %v333_v51, %v142_v53  ;;  %v379_v32 = vadd.s32 %v363_v9, %v210_v59  ;;  %v1824_v26 = vpack.c.bf16 %v696_v33, %v695_v27  ;;  %v245_v36 = vsel %vm229_vm8, 1, %v3984_v62  ;;  %v670_v61 = vld [vmem:[%s3878_s1 + $0x6f8] sm:$0xff]  ;;  %v684_v57 = vld [vmem:[%s3878_s1 + $0x768] sm:$0xff]  ;;  %v685_v9 = vld [vmem:[%s3878_s1 + $0x770] sm:$0xff] }
  0xf4   :  { %1789 = vmatprep.subr.bf16.mxu0 %v1788_v22  ;;  %v1798_v52 = vpack.c.bf16 %v650_v50, %v649_v20  ;;  %vm196_vm9 = vcmp.eq.s32.totalorder %v3657_v15, %v2652_v44  ;;  %v1800_v6 = vpack.c.bf16 %v668_v30, %v667_v13  ;;  %vm264_vm11 = vcmp.eq.s32.totalorder %v3573_v24, %v2682_v31  ;;  %v702_v7 = vld [vmem:[%s3878_s1 + $0x7f8] sm:$0xff] }
  0xf5   :  { %v177_v44 = vsel %vm161_vm10, 1, %v3984_v62  ;;  %v1826_v3 = vpack.c.bf16 %v680_v14, %v679_v43  ;;  %vm299_vm12 = vcmp.eq.s32.totalorder %v3573_v24, %v2713_v46  ;;  %v395_v22 = vadd.s32 %v379_v32, %v245_v36  ;;  %v701_v24 = vld [vmem:[%s3878_s1 + $0x7f0] sm:$0xff] }
  0xf6   :  { %1815 = vmatpush3.bf16.msra.mxu1 %v1814_v60  ;;  %v365_v25 = vadd.s32 %v349_v63, %v177_v44  ;;  %v212_v28 = vsel %vm196_vm9, 1, %v3984_v62  ;;  %v1828_v19 = vpack.c.bf16 %v698_v21, %v697_v18  ;;  %v1802_v29 = vpack.c.bf16 %v652_v48, %v651_v23 }
  0xf7   :  { %1817 = vmatprep.subr.bf16.mxu1 %v1816_v10  ;;  %1791 = vmatpush3.bf16.msra.mxu0 %v1790_v34  ;;  %v280_v60 = vsel %vm264_vm11, 1, %v3984_v62  ;;  %vm231_vm13 = vcmp.eq.s32.totalorder %v3657_v15, %v2654_v40  ;;  %v1804_v41 = vpack.c.bf16 %v670_v61, %v669_v2  ;;  %v653_v10 = vld [vmem:[%s3878_s1 + $0x670] sm:$0xff]  ;;  %v315_v38 = vsel %vm299_vm12, 1, %v3984_v62 }
  0xf8   :  { %1793 = vmatprep.subr.bf16.mxu0 %v1792_v5  ;;  %v381_v40 = vadd.s32 %v365_v25, %v212_v28  ;;  %v1830_v17 = vpack.c.bf16 %v682_v58, %v681_v37  ;;  %v411_v34 = vadd.s32 %v395_v22, %v280_v60  ;;  %v247_v4 = vsel %vm231_vm13, 1, %v3984_v62  ;;  %v1302_v58 = vld [vmem:[%s3879_s2] ss:$0 sm:$0xff] }
  0xf9   :  { %v1832_v5 = vpack.c.bf16 %v700_v8, %v699_v54  ;;  %v1806_v45 = vpack.c.bf16 %v654_v39, %v653_v10  ;;  %vm266_vm14 = vcmp.eq.s32.totalorder %v3657_v15, %v2682_v31  ;;  %vm301_vm15 = vcmp.eq.s32.totalorder %v3657_v15, %v2713_v46  ;;  %v1303_v8 = vld [vmem:[%s3880_s3] ss:$0 sm:$0xff] }
  0xfa   :  { %1819 = vmatpush3.bf16.msra.mxu1 %v1818_v35  ;;  %v427_v55 = vadd.s32 %v411_v34, %v315_v38  ;;  %v397_v42 = vadd.s32 %v381_v40, %v247_v4  ;;  %v1834_v51 = vpack.c.bf16 %v684_v57, %v683_v12  ;;  %v282_v35 = vsel %vm266_vm14, 1, %v3984_v62 }
  0xfb   :  { %1821 = vmatprep.subr.bf16.mxu1 %v1820_v11  ;;  %1795 = vmatpush3.bf16.msra.mxu0 %v1794_v16  ;;  %v1836_v31 = vpack.c.bf16 %v702_v7, %v701_v24  ;;  %v686_v11 = vld [vmem:[%s3878_s1 + $0x778] sm:$0xff]  ;;  %v317_v47 = vsel %vm301_vm15, 1, %v3984_v62  ;;  %vm1283_vm1 = vcmask 523264   ;;  %v4082_v38 = vlaneseq }
  0xfc   :  { %1797 = vmatprep.subr.bf16.mxu0 %v1796_v56  ;;  %v443_v1 = vcvt.s32.f32 %v427_v55  ;;  %v413_v46 = vadd.s32 %v397_v42, %v282_v35  ;;  %v1838_v15 = vpack.c.bf16 %v686_v11, %v685_v9  ;;  %vm1296_vm2 = vcmask 57344  }
  0xfd   :  { %v1292_v40 = vshrl.u32 %v4082_v38, 7 }
  0xfe   :  { %1823 = vmatpush3.bf16.msra.mxu1 %v1822_v0  ;;  %v429_v27 = vadd.s32 %v413_v46, %v317_v47 }
  0xff   :  { %1825 = vmatprep.subr.bf16.mxu1 %v1824_v26  ;;  %1799 = vmatpush3.bf16.msra.mxu0 %v1798_v52  ;;  %v1293_v34 = vsub.s32 %v2114_v49, %v1292_v40 }
 0x100   :  { %1801 = vmatprep.subr.bf16.mxu0 %v1800_v6  ;;  %v445_v16 = vcvt.s32.f32 %v429_v27 }
 0x102   :  { %1827 = vmatpush3.bf16.msra.mxu1 %v1826_v3 }
 0x103   :  { %1829 = vmatprep.subr.bf16.mxu1 %v1828_v19  ;;  %1803 = vmatpush3.bf16.msra.mxu0 %v1802_v29 }
 0x104   :  { %1805 = vmatprep.subr.bf16.mxu0 %v1804_v41 }
 0x106   :  { %1831 = vmatpush3.bf16.msra.mxu1 %v1830_v17  ;;  %v1288_v17 = vstv %s3881_s4 }
 0x107   :  { %1833 = vmatprep.subr.bf16.mxu1 %v1832_v5  ;;  %1807 = vmatpush3.bf16.msra.mxu0 %v1806_v45 }
 0x10a   :  { %1835 = vmatpush3.bf16.msra.mxu1 %v1834_v51  ;;  %1188 = vmatmul.mubr.f32.vlgmr.msra.gmra.mrb[6].mxu0 %v443_v1 }
 0x10b   :  { %1837 = vmatprep.subr.bf16.mxu1 %v1836_v31 }
 0x10e   :  { %1839 = vmatpush3.bf16.msra.mxu1 %v1838_v15 }
 0x111   :  { %1258 = vmatmul.mubr.f32.vlgmr.msra.gmra.mrb[6].mxu1 %v445_v16 }
 0x172   :  { %v1336_v59 = vpop.f32.mrb[0].mxu0 }
 0x173   :  { %v1337_v33 = vpop.f32.mrb[1].mxu0 }
 0x174   :  { %v1338_v56 = vadd.f32 %v1337_v33, %v1336_v59 }
 0x179   :  { %v1371_v20 = vpop.f32.mrb[0].mxu1 }
 0x17a   :  { %v1372_v50 = vpop.f32.mrb[1].mxu1 }
 0x17b   :  { %v1373_v53 = vadd.f32 %v1372_v50, %v1371_v20 }
 0x17d   :  { %v840_v13 = vadd.f32 %v1373_v53, %v1338_v56 }
 0x199   :  { %v1406_v30 = vpop.f32.mrb[2].mxu0 }
 0x19a   :  { %v1407_v63 = vpop.f32.mrb[3].mxu0 }
 0x19b   :  { %v1408_v0 = vadd.f32 %v1407_v63, %v1406_v30 }
 0x19d   :  { %v910_v62 = vadd.f32 %v1408_v0, %v840_v13 }
 0x1a2   :  { %v1441_v32 = vpop.f32.mrb[2].mxu1 }
 0x1a3   :  { %v1442_v26 = vpop.f32.mrb[3].mxu1 }
 0x1a4   :  { %v1443_v43 = vadd.f32 %v1442_v26, %v1441_v32 }
 0x1a6   :  { %v980_v14 = vadd.f32 %v1443_v43, %v910_v62 }
 0x1bc   :  { %v1476_v18 = vpop.f32.mrb[4].mxu0 }
 0x1bd   :  { %v1477_v52 = vpop.f32.mrb[5].mxu0 }
 0x1be   :  { %v1478_v36 = vadd.f32 %v1477_v52, %v1476_v18 }
 0x1c0   :  { %v1050_v21 = vadd.f32 %v1478_v36, %v980_v14 }
 0x1c4   :  { %v1511_v6 = vpop.f32.mrb[4].mxu1 }
 0x1c5   :  { %v1512_v23 = vpop.f32.mrb[5].mxu1 }
 0x1c6   :  { %v1513_v48 = vadd.f32 %v1512_v23, %v1511_v6 }
 0x1c8   :  { %v1120_v44 = vadd.f32 %v1513_v48, %v1050_v21 }
 0x1dd   :  { %v1546_v2 = vpop.f32.mrb[6].mxu0 }
 0x1de   :  { %v1547_v61 = vpop.f32.mrb[7].mxu0 }
 0x1df   :  { %v1548_v25 = vadd.f32 %v1547_v61, %v1546_v2 }
 0x1e1   :  { %v1190_v3 = vadd.f32 %v1548_v25, %v1120_v44 }
 0x1e4   :  { %v1581_v22 = vpop.f32.mrb[6].mxu1 }
 0x1e5   :  { %v1582_v28 = vpop.f32.mrb[7].mxu1 }
 0x1e6   :  { %v1583_v19 = vadd.f32 %v1582_v28, %v1581_v22 }
 0x1e8   :  { %v1260_v37 = vadd.f32 %v1583_v19, %v1190_v3 }
 0x1ea   :  { %v1263_v54 = vmul.f32 0.125, %v1260_v37 }
 0x1ec   :  { %v1271_v29 = vadd.f32 %v1302_v58, %v1263_v54 }
 0x1ee   :  { %vm1272_vm0 = vcmp.gt.f32.partialorder %v1271_v29, 0.0  ;;  %v1273_v60 = vmul.f32 0.01, %v1271_v29 }
 0x1f0   :  { %v1274_v41 = vsel %vm1272_vm0, %v1271_v29, %v1273_v60 }
 0x1f1   :  { %v1282_v10 = vmul.f32 %v1303_v8, %v1274_v41 }
 0x1f3   :  { %v1284_v39 = vsel %vm1283_vm1, %v1282_v10, 0.0 }
 0x1f4   :  { %1285 = vadd.xlane.f32.xlu0 %v1284_v39 }
 0x281   :  { %v1286_v4 = vpop.xlane.xlu0 %1285 }
 0x282   :  { %v1289_v5 = vadd.f32 %v1288_v17, %v1286_v4 }
 0x284   :  { %v1294_v12 = vrot.slane %v1289_v5, %v1293_v34 }
 0x286   :  { %1297 = vst.msk [vmem:[%s3882_s5] sm:$0x1] %vm1296_vm2, %v1294_v12 }

</bundles_post_ra>
